<compile_context>
chip_gen: v7x
topology: tpu7x:2x2x1
jax: 0.10.0
libtpu: 0.0.40
codegen_flags: <defaults>
</compile_context>

<pallas_src>
import functools
import math

import jax
import jax.numpy as jnp
from jax.experimental import pallas as pl
from jax.experimental.pallas import tpu as pltpu

HIDDEN = 32          # hidden_size
N_BRANCH = 6         # number of parallel l1_* linear layers
D1 = 100             # each branch's real output width
D1P = 128            # padded branch width (lane aligned)
D2 = 512             # l2 output width
D3 = 2               # l3 output width (num classes)
D3P = 128            # padded l3 width (lane-dense output block)
DROPOUT_P = 0.6      # nn.Dropout(0.6) -> keep prob 0.4

D_IN = N_BRANCH * HIDDEN    # 192  (packed branch inputs)
D_CAT = N_BRANCH * D1P      # 768  (padded concat width)


def mlp_kernel(*refs, train_mode, apply_dropout):
    """Whole MLP forward for one batch tile.

    x_ref : (TB, 192)    w1_ref: (192, 768)   b1_ref: (1, 768)
    w2_ref: (768, 512)   b2_ref: (1, 512)
    w3_ref: (512, 128)   b3_ref: (1, 128)
    mask_ref (optional, dropout): (TB, 768) scaled keep mask
    out_ref: (TB, 128)   (only first 2 columns meaningful)
    """
    if apply_dropout:
        (x_ref, w1_ref, b1_ref, w2_ref, b2_ref, w3_ref, b3_ref,
         mask_ref, out_ref) = refs
    else:
        (x_ref, w1_ref, b1_ref, w2_ref, b2_ref, w3_ref, b3_ref,
         out_ref) = refs
        mask_ref = None

    # Fused six-branch Linear + ReLU (block-diagonal W1, zero-padded slots).
    h = jnp.dot(x_ref[...], w1_ref[...], preferred_element_type=jnp.float32)
    h = jnp.maximum(h + b1_ref[...], 0.0)

    # Dropout on the (virtual) concatenated activation: one VPU multiply.
    if apply_dropout:
        h = h * mask_ref[...]

    # l2: (TB, 768) @ (768, 512); padded rows of W2 are zero so this equals
    # concat(h_real) @ W2_original exactly.
    y = jnp.dot(h, w2_ref[...], preferred_element_type=jnp.float32)
    y = jnp.maximum(y + b2_ref[...], 0.0)

    # l3, lane-dense: (TB, 512) @ (512, 128); columns >= 2 are zero.
    logits = jnp.dot(y, w3_ref[...], preferred_element_type=jnp.float32)
    logits = logits + b3_ref[...]

    if train_mode:
        out_ref[...] = logits
    else:
        # LogSoftmax(dim=1) over the first D3 real columns only.
        col = jax.lax.broadcasted_iota(jnp.int32, logits.shape, 1)
        valid = col < D3
        masked = jnp.where(valid, logits, jnp.float32(-jnp.inf))
        m = jnp.max(masked, axis=1, keepdims=True)
        e = jnp.where(valid, jnp.exp(logits - m), 0.0)
        lse = jnp.log(jnp.sum(e, axis=1, keepdims=True)) + m
        out_ref[...] = logits - lse


def mlp_forward(packed, x_flat, *, train_mode=True, dropout_mask=None):
    """One pallas_call over a batch grid; weights stay resident each step."""
    w1, b1, w2, b2, w3, b3 = packed
    batch = x_flat.shape[0]
    apply_dropout = dropout_mask is not None

    # Batch tiling: a single block for small batches, 256-row tiles otherwise
    # (keeps the working set tiny relative to VMEM on all generations and lets
    # v7x's two TensorCores split the "parallel" axis for big batches).
    tb = batch if batch <= 256 else 256
    grid = (pl.cdiv(batch, tb),)

    xmap = lambda i: (i, 0)   # batch-tiled arrays
    wmap = lambda i: (0, 0)   # weights / biases: same full block every step

    in_specs = [
        pl.BlockSpec((tb, D_IN), xmap),
        pl.BlockSpec((D_IN, D_CAT), wmap),
        pl.BlockSpec((1, D_CAT), wmap),
        pl.BlockSpec((D_CAT, D2), wmap),
        pl.BlockSpec((1, D2), wmap),
        pl.BlockSpec((D2, D3P), wmap),
        pl.BlockSpec((1, D3P), wmap),
    ]
    args = [x_flat, w1, b1, w2, b2, w3, b3]
    if apply_dropout:
        in_specs.append(pl.BlockSpec((tb, D_CAT), xmap))
        args.append(dropout_mask)

    kernel = functools.partial(mlp_kernel, train_mode=train_mode,
                               apply_dropout=apply_dropout)

    out_pad = pl.pallas_call(
        kernel,
        out_shape=jax.ShapeDtypeStruct((batch, D3P), jnp.float32),
        grid=grid,
        in_specs=in_specs,
        out_specs=pl.BlockSpec((tb, D3P), xmap),
        compiler_params=pltpu.CompilerParams(
            dimension_semantics=("parallel",)),
    )(*args)

    # Only the first two lanes are real logits / log-probs.
    return out_pad[:, :D3]


# ---------------------------------------------------------------------------
# Parameter init (PyTorch nn.Linear default: U[-1/sqrt(fan_in), 1/sqrt(fan_in)],
# weights stored as (in, out)) + packing into the padded/fused kernel layout.
# ---------------------------------------------------------------------------
def linear_init(key, fan_in, fan_out):
    kw, kb = jax.random.split(key)
    bound = 1.0 / math.sqrt(fan_in)
    w = jax.random.uniform(kw, (fan_in, fan_out), jnp.float32, -bound, bound)
    b = jax.random.uniform(kb, (fan_out,), jnp.float32, -bound, bound)
    return w, b


def init_params(key, hidden_size):
    keys = jax.random.split(key, N_BRANCH + 2)
    w1_list, b1_list = [], []
    for i in range(N_BRANCH):
        w, b = linear_init(keys[i], hidden_size, D1)
        w1_list.append(w)                      # (H, 100)
        b1_list.append(b)                      # (100,)
    w2, b2 = linear_init(keys[N_BRANCH], N_BRANCH * D1, D2)   # (600, 512)
    w3, b3 = linear_init(keys[N_BRANCH + 1], D2, D3)          # (512, 2)
    return (w1_list, b1_list, w2, b2, w3, b3)


def pack_params(params, hidden_size):
    """Canonical (PyTorch-layout) params -> padded / fused kernel layout."""
    w1_list, b1_list, w2, b2, w3, b3 = params
    h = hidden_size
    w1_blk = jnp.zeros((N_BRANCH * h, D_CAT), jnp.float32)
    b1_pad = jnp.zeros((1, D_CAT), jnp.float32)
    w2_pad = jnp.zeros((D_CAT, D2), jnp.float32)
    for i in range(N_BRANCH):
        w1_blk = w1_blk.at[i * h:(i + 1) * h, i * D1P:i * D1P + D1].set(w1_list[i])
        b1_pad = b1_pad.at[0, i * D1P:i * D1P + D1].set(b1_list[i])
        w2_pad = w2_pad.at[i * D1P:i * D1P + D1, :].set(w2[i * D1:(i + 1) * D1, :])
    b2_pad = b2[None, :]                                               # (1, 512)
    w3_pad = jnp.zeros((D2, D3P), jnp.float32).at[:, :D3].set(w3)      # (512, 128)
    b3_pad = jnp.zeros((1, D3P), jnp.float32).at[0, :D3].set(b3)       # (1, 128)
    return (w1_blk, b1_pad, w2_pad, b2_pad, w3_pad, b3_pad)


def pack_inputs(x_stacked):
    """(6, B, H) branch inputs -> (B, 6*H) packed matrix."""
    n, b, h = x_stacked.shape
    return jnp.transpose(x_stacked, (1, 0, 2)).reshape(b, n * h)


def ref_forward(params, x_stacked, train_mode, mask600=None):
    """Pure-JAX reference mirroring the PyTorch graph."""
    w1_list, b1_list, w2, b2, w3, b3 = params
    hs = [jax.nn.relu(x_stacked[i] @ w1_list[i] + b1_list[i])
          for i in range(N_BRANCH)]
    y = jnp.concatenate(hs, axis=1)                 # (B, 600)
    if mask600 is not None:                         # dropout (same mask)
        y = y * mask600
    y = jax.nn.relu(y @ w2 + b2)
    logits = y @ w3 + b3
    return logits if train_mode else jax.nn.log_softmax(logits, axis=1)


if __name__ == "__main__":
    key = jax.random.PRNGKey(0)
    k_param, k_x, k_drop = jax.random.split(key, 3)

    batch = 8
    params = init_params(k_param, HIDDEN)
    packed = pack_params(params, HIDDEN)

    # x corresponds to the PyTorch call sites x[0]..x[5], each (batch, hidden)
    x_stacked = jax.random.normal(k_x, (N_BRANCH, batch, HIDDEN), jnp.float32)
    x_flat = pack_inputs(x_stacked)

    TOL = dict(rtol=1e-2, atol=1e-2)   # covers MXU bf16-pass default precision

    # 1) train_mode=True, no dropout (module.eval() numerics): raw logits.
    out_train = mlp_forward(packed, x_flat, train_mode=True)
    jax.block_until_ready(out_train)
    ref_train = ref_forward(params, x_stacked, train_mode=True)
    assert out_train.shape == (batch, D3)
    assert jnp.allclose(out_train, ref_train, **TOL)

    # 2) train_mode=False: LogSoftmax(dim=1) of the logits.
    out_eval = mlp_forward(packed, x_flat, train_mode=False)
    jax.block_until_ready(out_eval)
    ref_eval = ref_forward(params, x_stacked, train_mode=False)
    assert jnp.allclose(out_eval, ref_eval, **TOL)

    # 3) training-time dropout (p=0.6, inverted scaling 1/0.4), mask generated
    #    host-side with jax.random and shared with the reference.
    keep_prob = 1.0 - DROPOUT_P
    mask_pad = (jax.random.bernoulli(k_drop, keep_prob, (batch, D_CAT))
                .astype(jnp.float32) / keep_prob)                   # (B, 768)
    mask600 = mask_pad.reshape(batch, N_BRANCH, D1P)[:, :, :D1] \
                      .reshape(batch, N_BRANCH * D1)                # (B, 600)
    out_drop = mlp_forward(packed, x_flat, train_mode=True,
                           dropout_mask=mask_pad)
    jax.block_until_ready(out_drop)
    ref_drop = ref_forward(params, x_stacked, train_mode=True, mask600=mask600)
    assert out_drop.shape == (batch, D3)
    assert jnp.allclose(out_drop, ref_drop, **TOL)
    assert bool(jnp.all(jnp.isfinite(out_drop)))

    print("KERNEL_OK")
</pallas_src>

<mosaic_0001>
module attributes {stable_mosaic.version = 11 : i64} {
  func.func @mlp_kernel(%arg0: i32, %arg1: memref<8x192xf32, #tpu.memory_space<vmem>>, %arg2: memref<192x768xf32, #tpu.memory_space<vmem>>, %arg3: memref<1x768xf32, #tpu.memory_space<vmem>>, %arg4: memref<768x512xf32, #tpu.memory_space<vmem>>, %arg5: memref<1x512xf32, #tpu.memory_space<vmem>>, %arg6: memref<512x128xf32, #tpu.memory_space<vmem>>, %arg7: memref<1x128xf32, #tpu.memory_space<vmem>>, %arg8: memref<8x128xf32, #tpu.memory_space<vmem>>) attributes {dimension_semantics = [#tpu.dimension_semantics<parallel>], iteration_bounds = array<i64: 1>, scalar_prefetch = 0 : i64, scratch_operands = 0 : i64, tpu.core_type = #tpu.core_type<tc>, window_params = [{transform_indices = @transform_0, window_bounds = array<i64: 8, 192>}, {pipeline_mode = #tpu.pipeline_mode<synchronous>, transform_indices = @transform_1, window_bounds = array<i64: 192, 768>}, {pipeline_mode = #tpu.pipeline_mode<synchronous>, transform_indices = @transform_2, window_bounds = array<i64: 1, 768>}, {pipeline_mode = #tpu.pipeline_mode<synchronous>, transform_indices = @transform_3, window_bounds = array<i64: 768, 512>}, {pipeline_mode = #tpu.pipeline_mode<synchronous>, transform_indices = @transform_4, window_bounds = array<i64: 1, 512>}, {pipeline_mode = #tpu.pipeline_mode<synchronous>, transform_indices = @transform_5, window_bounds = array<i64: 512, 128>}, {pipeline_mode = #tpu.pipeline_mode<synchronous>, transform_indices = @transform_6, window_bounds = array<i64: 1, 128>}, {transform_indices = @transform_7, window_bounds = array<i64: 8, 128>}]} {
    %c0 = arith.constant 0 : index
    %c0_0 = arith.constant 0 : index
    %0 = vector.load %arg1[%c0, %c0_0] : memref<8x192xf32, #tpu.memory_space<vmem>>, vector<8x192xf32>
    %c0_1 = arith.constant 0 : index
    %c0_2 = arith.constant 0 : index
    %1 = vector.load %arg2[%c0_1, %c0_2] : memref<192x768xf32, #tpu.memory_space<vmem>>, vector<192x768xf32>
    %cst = arith.constant dense<0.000000e+00> : vector<8x768xf32>
    %2 = tpu.matmul %0, %1, %cst {dimension_numbers = #tpu.dot_dimension_numbers<[1], [0], [0], [1], [0, 0, 1, 1], [], []>} : vector<8x192xf32>, vector<192x768xf32>, vector<8x768xf32> -> vector<8x768xf32>
    %c0_3 = arith.constant 0 : index
    %c0_4 = arith.constant 0 : index
    %3 = vector.load %arg3[%c0_3, %c0_4] : memref<1x768xf32, #tpu.memory_space<vmem>>, vector<1x768xf32>
    %4 = vector.broadcast %3 : vector<1x768xf32> to vector<8x768xf32>
    %5 = arith.addf %2, %4 : vector<8x768xf32>
    %cst_5 = arith.constant 0.000000e+00 : f32
    %6 = vector.broadcast %cst_5 : f32 to vector<8x768xf32>
    %7 = arith.maximumf %5, %6 : vector<8x768xf32>
    %c0_6 = arith.constant 0 : index
    %c0_7 = arith.constant 0 : index
    %8 = vector.load %arg4[%c0_6, %c0_7] : memref<768x512xf32, #tpu.memory_space<vmem>>, vector<768x512xf32>
    %cst_8 = arith.constant dense<0.000000e+00> : vector<8x512xf32>
    %9 = tpu.matmul %7, %8, %cst_8 {dimension_numbers = #tpu.dot_dimension_numbers<[1], [0], [0], [1], [0, 0, 1, 1], [], []>} : vector<8x768xf32>, vector<768x512xf32>, vector<8x512xf32> -> vector<8x512xf32>
    %c0_9 = arith.constant 0 : index
    %c0_10 = arith.constant 0 : index
    %10 = vector.load %arg5[%c0_9, %c0_10] : memref<1x512xf32, #tpu.memory_space<vmem>>, vector<1x512xf32>
    %11 = vector.broadcast %10 : vector<1x512xf32> to vector<8x512xf32>
    %12 = arith.addf %9, %11 : vector<8x512xf32>
    %cst_11 = arith.constant 0.000000e+00 : f32
    %13 = vector.broadcast %cst_11 : f32 to vector<8x512xf32>
    %14 = arith.maximumf %12, %13 : vector<8x512xf32>
    %c0_12 = arith.constant 0 : index
    %c0_13 = arith.constant 0 : index
    %15 = vector.load %arg6[%c0_12, %c0_13] : memref<512x128xf32, #tpu.memory_space<vmem>>, vector<512x128xf32>
    %cst_14 = arith.constant dense<0.000000e+00> : vector<8x128xf32>
    %16 = tpu.matmul %14, %15, %cst_14 {dimension_numbers = #tpu.dot_dimension_numbers<[1], [0], [0], [1], [0, 0, 1, 1], [], []>} : vector<8x512xf32>, vector<512x128xf32>, vector<8x128xf32> -> vector<8x128xf32>
    %c0_15 = arith.constant 0 : index
    %c0_16 = arith.constant 0 : index
    %17 = vector.load %arg7[%c0_15, %c0_16] : memref<1x128xf32, #tpu.memory_space<vmem>>, vector<1x128xf32>
    %18 = vector.broadcast %17 : vector<1x128xf32> to vector<8x128xf32>
    %19 = arith.addf %16, %18 : vector<8x128xf32>
    %c0_17 = arith.constant 0 : index
    %c0_18 = arith.constant 0 : index
    %20 = vector.load %arg8[%c0_17, %c0_18] : memref<8x128xf32, #tpu.memory_space<vmem>>, vector<8x128xf32>
    tpu.vector_store %arg8[%c0_17, %c0_18], %19 {strides = array<i32>} : memref<8x128xf32, #tpu.memory_space<vmem>>, vector<8x128xf32>,
    return
  }
  func.func @transform_0(%arg0: i32) -> (i32, i32) {
    %c0_i32 = arith.constant 0 : i32
    %c0_i32_0 = arith.constant 0 : i32
    return %arg0, %c0_i32 : i32, i32
  }
  func.func @transform_1(%arg0: i32) -> (i32, i32) {
    %c0_i32 = arith.constant 0 : i32
    %c0_i32_0 = arith.constant 0 : i32
    %c0_i32_1 = arith.constant 0 : i32
    return %c0_i32, %c0_i32_0 : i32, i32
  }
  func.func @transform_2(%arg0: i32) -> (i32, i32) {
    %c0_i32 = arith.constant 0 : i32
    %c0_i32_0 = arith.constant 0 : i32
    %c0_i32_1 = arith.constant 0 : i32
    return %c0_i32, %c0_i32_0 : i32, i32
  }
  func.func @transform_3(%arg0: i32) -> (i32, i32) {
    %c0_i32 = arith.constant 0 : i32
    %c0_i32_0 = arith.constant 0 : i32
    %c0_i32_1 = arith.constant 0 : i32
    return %c0_i32, %c0_i32_0 : i32, i32
  }
  func.func @transform_4(%arg0: i32) -> (i32, i32) {
    %c0_i32 = arith.constant 0 : i32
    %c0_i32_0 = arith.constant 0 : i32
    %c0_i32_1 = arith.constant 0 : i32
    return %c0_i32, %c0_i32_0 : i32, i32
  }
  func.func @transform_5(%arg0: i32) -> (i32, i32) {
    %c0_i32 = arith.constant 0 : i32
    %c0_i32_0 = arith.constant 0 : i32
    %c0_i32_1 = arith.constant 0 : i32
    return %c0_i32, %c0_i32_0 : i32, i32
  }
  func.func @transform_6(%arg0: i32) -> (i32, i32) {
    %c0_i32 = arith.constant 0 : i32
    %c0_i32_0 = arith.constant 0 : i32
    %c0_i32_1 = arith.constant 0 : i32
    return %c0_i32, %c0_i32_0 : i32, i32
  }
  func.func @transform_7(%arg0: i32) -> (i32, i32) {
    %c0_i32 = arith.constant 0 : i32
    %c0_i32_0 = arith.constant 0 : i32
    return %arg0, %c0_i32 : i32, i32
  }
}

</mosaic_0001>

<bundles_post_ra>
// kernel: tpu_custom_call.1
= control target key start
LH: loop header
LB: loop body
LE: loop exit
PB: predicated region body
PF: predicated region fallthrough
CT: control target
= control target key end

     0   :  { %12 = vsyncpa [#allocation3], 0  ;;  %s2672_s0 = inlined_call_operand.hbm [shape: f32[8,192], index: 0, kind: input, shape index: {}]   ;;  %s2673_s1 = inlined_call_operand.hbm [shape: f32[192,768], index: 1, kind: input, shape index: {}]   ;;  %s2674_s2 = inlined_call_operand.hbm [shape: f32[1,768], index: 2, kind: input, shape index: {}]   ;;  %s2675_s3 = inlined_call_operand.hbm [shape: f32[768,512], index: 3, kind: input, shape index: {}]   ;;  %s2676_s4 = inlined_call_operand.hbm [shape: f32[1,512], index: 4, kind: input, shape index: {}]   ;;  %s2677_s5 = inlined_call_operand.hbm [shape: f32[512,128], index: 5, kind: input, shape index: {}]   ;;  %s2678_s6 = inlined_call_operand.hbm [shape: f32[1,128], index: 6, kind: input, shape index: {}]   ;;  %s2679_s7 = inlined_call_operand.hbm [shape: f32[8,128], index: 7, kind: output, shape index: {}]  }
   0x1   :  { %13 = vsyncpa [#allocation6], 0 }
   0x2   :  { %14 = vsyncpa [#allocation9], 0 }
   0x3   :  { %15 = vsyncpa [#allocation12], 0 }
   0x4   :  { %16 = vsyncpa [#allocation4], 0  ;;  %s2460_s24 = smov [#allocation5]   ;;  %s2274_s28 = scalar_lea.hbm %s2673_s1, 18432 }
   0x5   :  { %s32_s25 = sshll.u32 %s2460_s24, 4  ;;  %p2275_p0 = scmp.ne.s32.totalorder %s2673_s1, %s2274_s28  ;;  %s33_s25 = int_to_ptr.vmem [resolvable:$true] %s32_s25 }
   0x6   :  { %p2278_p1 = scmp.lt.u32.totalorder %s2274_s28, %s2673_s1 }
   0x8   :  { %p2280_p2 = pnand %p2278_p1, %p2275_p0 }
   0xa   :  { %2283 = shalt.err (!%p2280_p2)
}
   0xb   :  { %s2284_s10 = scalar_lea.vmem %s33_s25, 18432  ;;  %p2289_p4 = scmp.lt.s32.totalorder %s33_s25, %s33_s25 }
   0xc   :  { %p2285_p3 = scmp.ne.s32.totalorder %s33_s25, %s2284_s10  ;;  %p2290_p5 = scmp.lt.s32.totalorder %s2284_s10, %s2284_s10 }
   0xe   :  { %p2291_p6 = por %p2290_p5, %p2289_p4 }
  0x10   :  { %p2292_p7 = pnand %p2291_p6, %p2285_p3 }
  0x12   :  { %2295 = shalt.err (!%p2292_p7)
}
  0x13   :  { %s2461_s11 = smov 768   ;;  %s2462_s12 = smov 48  }
  0x14   :  { %38 = dma.hbm_to_vmem [thread:$0]  %s2673_s1, 18432, %s33_s25, [#allocation6], %s2461_s11, %s2461_s11, %s2462_s12  }
  0x15   :  { %s2463_s15 = smov [#allocation8]   ;;  %s2296_s19 = scalar_lea.hbm %s2675_s3, 49152 }
  0x16   :  { %s54_s16 = sshll.u32 %s2463_s15, 4  ;;  %p2297_p8 = scmp.ne.s32.totalorder %s2675_s3, %s2296_s19  ;;  %s55_s16 = int_to_ptr.vmem [resolvable:$true] %s54_s16 }
  0x17   :  { %p2300_p9 = scmp.lt.u32.totalorder %s2296_s19, %s2675_s3 }
  0x19   :  { %p2302_p10 = pnand %p2300_p9, %p2297_p8 }
  0x1b   :  { %2305 = shalt.err (!%p2302_p10)
}
  0x1c   :  { %s2306_s24 = scalar_lea.vmem %s55_s16, 49152  ;;  %p2311_p12 = scmp.lt.s32.totalorder %s55_s16, %s55_s16 }
  0x1d   :  { %p2307_p11 = scmp.ne.s32.totalorder %s55_s16, %s2306_s24  ;;  %p2312_p13 = scmp.lt.s32.totalorder %s2306_s24, %s2306_s24 }
  0x1f   :  { %p2313_p0 = por %p2312_p13, %p2311_p12 }
  0x21   :  { %p2314_p1 = pnand %p2313_p0, %p2307_p11 }
  0x23   :  { %2317 = shalt.err (!%p2314_p1)
}
  0x24   :  { %s2464_s1 = smov 512   ;;  %s2465_s25 = smov 32  }
  0x25   :  { %60 = dma.hbm_to_vmem [thread:$0]  %s2675_s3, 49152, %s55_s16, [#allocation9], %s2464_s1, %s2464_s1, %s2465_s25  }
  0x26   :  { %s2466_s28 = smov [#allocation11]   ;;  %s2318_s9 = scalar_lea.hbm %s2677_s5, 8192 }
  0x27   :  { %s76_s29 = sshll.u32 %s2466_s28, 4  ;;  %p2319_p2 = scmp.ne.s32.totalorder %s2677_s5, %s2318_s9  ;;  %s77_s29 = int_to_ptr.vmem [resolvable:$true] %s76_s29 }
  0x28   :  { %p2322_p3 = scmp.lt.u32.totalorder %s2318_s9, %s2677_s5 }
  0x2a   :  { %p2324_p4 = pnand %p2322_p3, %p2319_p2 }
  0x2c   :  { %2327 = shalt.err (!%p2324_p4)
}
  0x2d   :  { %s2328_s14 = scalar_lea.vmem %s77_s29, 8192  ;;  %p2333_p6 = scmp.lt.s32.totalorder %s77_s29, %s77_s29 }
  0x2e   :  { %p2329_p5 = scmp.ne.s32.totalorder %s77_s29, %s2328_s14  ;;  %p2334_p7 = scmp.lt.s32.totalorder %s2328_s14, %s2328_s14 }
  0x30   :  { %p2335_p8 = por %p2334_p7, %p2333_p6 }
  0x32   :  { %p2336_p9 = pnand %p2335_p8, %p2329_p5 }
  0x34   :  { %2339 = shalt.err (!%p2336_p9)
}
  0x35   :  { %s2467_s3 = smov 128   ;;  %s2468_s15 = smov 8  }
  0x36   :  { %82 = dma.hbm_to_vmem [thread:$0]  %s2677_s5, 8192, %s77_s29, [#allocation12], %s2467_s3, %s2467_s3, %s2468_s15  }
  0x37   :  { %s2469_s18 = smov [#allocation2]   ;;  %s2470_s20 = smov [#allocation7]  }
  0x38   :  { %s23_s19 = sshll.u32 %s2469_s18, 4  ;;  %s45_s21 = sshll.u32 %s2470_s20, 4  ;;  %s24_s19 = int_to_ptr.vmem [resolvable:$true] %s23_s19  ;;  %s46_s21 = int_to_ptr.vmem [resolvable:$true] %s45_s21 }
  0x39   :  { %s2340_s24 = scalar_lea.hbm %s2672_s0, 256 }
  0x3a   :  { %p2341_p10 = scmp.ne.s32.totalorder %s2672_s0, %s2340_s24  ;;  %p2344_p11 = scmp.lt.u32.totalorder %s2340_s24, %s2672_s0 }
  0x3c   :  { %p2346_p12 = pnand %p2344_p11, %p2341_p10 }
  0x3e   :  { %2349 = shalt.err (!%p2346_p12)
}
  0x3f   :  { %s2350_s5 = scalar_lea.vmem %s24_s19, 256  ;;  %p2355_p0 = scmp.lt.s32.totalorder %s24_s19, %s24_s19 }
  0x40   :  { %p2351_p13 = scmp.ne.s32.totalorder %s24_s19, %s2350_s5  ;;  %p2356_p1 = scmp.lt.s32.totalorder %s2350_s5, %s2350_s5 }
  0x42   :  { %p2357_p2 = por %p2356_p1, %p2355_p0 }
  0x44   :  { %p2358_p3 = pnand %p2357_p2, %p2351_p13 }
  0x46   :  { %2361 = shalt.err (!%p2358_p3)
}
  0x47   :  { %26 = dma.hbm_to_vmem [thread:$0]  %s2672_s0, 256, %s24_s19, [#allocation3]  }
  0x48   :  { %s2362_s9 = scalar_lea.hbm %s2674_s2, 96 }
  0x49   :  { %p2363_p4 = scmp.ne.s32.totalorder %s2674_s2, %s2362_s9  ;;  %p2366_p5 = scmp.lt.u32.totalorder %s2362_s9, %s2674_s2 }
  0x4b   :  { %p2368_p6 = pnand %p2366_p5, %p2363_p4 }
  0x4d   :  { %2371 = shalt.err (!%p2368_p6)
}
  0x4e   :  { %s2372_s14 = scalar_lea.vmem %s46_s21, 96  ;;  %p2377_p8 = scmp.lt.s32.totalorder %s46_s21, %s46_s21 }
  0x4f   :  { %p2373_p7 = scmp.ne.s32.totalorder %s46_s21, %s2372_s14  ;;  %p2378_p9 = scmp.lt.s32.totalorder %s2372_s14, %s2372_s14 }
  0x51   :  { %p2379_p10 = por %p2378_p9, %p2377_p8 }
  0x53   :  { %p2380_p11 = pnand %p2379_p10, %p2373_p7 }
  0x55   :  { %2383 = shalt.err (!%p2380_p11)
}
  0x56   :  { %48 = dma.hbm_to_vmem [thread:$0]  %s2674_s2, 96, %s46_s21, [#allocation6]  }
  0x57   :  { %s2471_s15 = smov [#allocation10]   ;;  %s2472_s17 = smov [#allocation13]  }
  0x58   :  { %s67_s16 = sshll.u32 %s2471_s15, 4  ;;  %s89_s18 = sshll.u32 %s2472_s17, 4  ;;  %s68_s16 = int_to_ptr.vmem [resolvable:$true] %s67_s16  ;;  %s90_s18 = int_to_ptr.vmem [resolvable:$true] %s89_s18 }
  0x59   :  { %s2384_s22 = scalar_lea.hbm %s2676_s4, 64 }
  0x5a   :  { %p2385_p12 = scmp.ne.s32.totalorder %s2676_s4, %s2384_s22  ;;  %p2388_p13 = scmp.lt.u32.totalorder %s2384_s22, %s2676_s4 }
  0x5c   :  { %p2390_p0 = pnand %p2388_p13, %p2385_p12 }
  0x5e   :  { %2393 = shalt.err (!%p2390_p0)
}
  0x5f   :  { %s2394_s2 = scalar_lea.vmem %s68_s16, 64  ;;  %p2399_p2 = scmp.lt.s32.totalorder %s68_s16, %s68_s16 }
  0x60   :  { %p2395_p1 = scmp.ne.s32.totalorder %s68_s16, %s2394_s2  ;;  %p2400_p3 = scmp.lt.s32.totalorder %s2394_s2, %s2394_s2 }
  0x62   :  { %p2401_p4 = por %p2400_p3, %p2399_p2 }
  0x64   :  { %p2402_p5 = pnand %p2401_p4, %p2395_p1 }
  0x66   :  { %2405 = shalt.err (!%p2402_p5)
}
  0x67   :  { %70 = dma.hbm_to_vmem [thread:$0]  %s2676_s4, 64, %s68_s16, [#allocation9]  }
  0x68   :  { %s2406_s28 = scalar_lea.hbm %s2678_s6, 16 }
  0x69   :  { %p2407_p6 = scmp.ne.s32.totalorder %s2678_s6, %s2406_s28  ;;  %p2410_p7 = scmp.lt.u32.totalorder %s2406_s28, %s2678_s6 }
  0x6b   :  { %p2412_p8 = pnand %p2410_p7, %p2407_p6 }
  0x6d   :  { %2415 = shalt.err (!%p2412_p8)
}
  0x6e   :  { %s2416_s10 = scalar_lea.vmem %s90_s18, 16  ;;  %s2420_s11 = scalar_lea.vmem %s90_s18, 32 }
  0x6f   :  { %p2417_p9 = scmp.ne.s32.totalorder %s90_s18, %s2416_s10  ;;  %p2421_p10 = scmp.lt.s32.totalorder %s90_s18, %s90_s18 }
  0x70   :  { %p2422_p11 = scmp.lt.s32.totalorder %s2420_s11, %s2416_s10 }
  0x72   :  { %p2423_p12 = por %p2422_p11, %p2421_p10 }
  0x74   :  { %p2424_p13 = pnand %p2423_p12, %p2417_p9 }
  0x76   :  { %2427 = shalt.err (!%p2424_p13)
}
  0x77   :  { %92 = dma.hbm_to_vmem [thread:$0]  %s2678_s6, 16, %s90_s18, [#allocation12]  }
  0x78   :  { %2450 = dma.done.wait [#allocation3], 256  }
  0x79   :  { %2451 = vsyncadd [#allocation3], 4294967040 }
  0x7a   :  { %2452 = dma.done.wait [#allocation6], 18528  }
  0x7b   :  { %2453 = vsyncadd [#allocation6], 4294948768 }
  0x7c   :  { %2454 = dma.done.wait [#allocation9], 49216  }
  0x7d   :  { %2455 = vsyncadd [#allocation9], 4294918080 }
  0x7e   :  { %2456 = dma.done.wait [#allocation12], 8208  }
  0x7f   :  { %2457 = vsyncadd [#allocation12], 4294959088  ;;  %v117_v0 = vld [vmem:[#allocation5 + $0x8] sm:$0xff]  ;;  %v123_v1 = vld [vmem:[#allocation5 + $0x38] sm:$0xff]  ;;  %vm292_vm0 = vcmask 523264   ;;  %s2473_s6 = smov [#allocation14]  }
  0x80   :  { %v116_v2 = vld [vmem:[#allocation5] sm:$0xff]  ;;  %v1655_v3 = vpack.c.bf16 %v123_v1, %v117_v0  ;;  %v122_v4 = vld [vmem:[#allocation5 + $0x30] sm:$0xff]  ;;  %v129_v5 = vld [vmem:[#allocation5 + $0x68] sm:$0xff]  ;;  %s1569_s13 = sshll.u32 %s2473_s6, 4  ;;  %s1570_s13 = int_to_ptr.vmem [resolvable:$true] %s1569_s13 }
  0x81   :  { %v135_v6 = vld [vmem:[#allocation5 + $0x98] sm:$0xff]  ;;  %v1657_v7 = vpack.c.bf16 %v122_v4, %v116_v2  ;;  %v128_v9 = vld [vmem:[#allocation5 + $0x60] sm:$0xff]  ;;  %v134_v10 = vld [vmem:[#allocation5 + $0x90] sm:$0xff]  ;;  %s2428_s14 = scalar_lea.vmem %s1570_s13, 128  ;;  %p2433_p1 = scmp.lt.s32.totalorder %s1570_s13, %s1570_s13 }
  0x82   :  { %v1659_v8 = vpack.c.bf16 %v135_v6, %v129_v5  ;;  %v141_v11 = vld [vmem:[#allocation5 + $0xc8] sm:$0xff]  ;;  %1656 = vmatprep.subr.bf16.mxu0 %v1655_v3  ;;  %v147_v12 = vld [vmem:[#allocation5 + $0xf8] sm:$0xff]  ;;  %v1661_v13 = vpack.c.bf16 %v134_v10, %v128_v9  ;;  %v140_v15 = vld [vmem:[#allocation5 + $0xc0] sm:$0xff]  ;;  %p2429_p0 = scmp.ne.s32.totalorder %s1570_s13, %s2428_s14  ;;  %p2434_p2 = scmp.lt.s32.totalorder %s2428_s14, %s2428_s14 }
  0x83   :  { %1658 = vmatpush1.bf16.msra.mxu0 %v1657_v7  ;;  %v1663_v14 = vpack.c.bf16 %v147_v12, %v141_v11  ;;  %v146_v16 = vld [vmem:[#allocation5 + $0xf0] sm:$0xff]  ;;  %v153_v17 = vld [vmem:[#allocation5 + $0x128] sm:$0xff]  ;;  %v159_v18 = vld [vmem:[#allocation5 + $0x158] sm:$0xff] }
  0x84   :  { %1660 = vmatprep.subr.bf16.mxu0 %v1659_v8  ;;  %v1665_v19 = vpack.c.bf16 %v146_v16, %v140_v15  ;;  %v1667_v20 = vpack.c.bf16 %v159_v18, %v153_v17  ;;  %v152_v21 = vld [vmem:[#allocation5 + $0x120] sm:$0xff]  ;;  %v158_v22 = vld [vmem:[#allocation5 + $0x150] sm:$0xff]  ;;  %v165_v23 = vld [vmem:[#allocation5 + $0x188] sm:$0xff]  ;;  %p2435_p3 = por %p2434_p2, %p2433_p1 }
  0x85   :  { %v171_v24 = vld [vmem:[#allocation5 + $0x1b8] sm:$0xff]  ;;  %v1669_v25 = vpack.c.bf16 %v158_v22, %v152_v21  ;;  %v164_v27 = vld [vmem:[#allocation5 + $0x180] sm:$0xff]  ;;  %v170_v28 = vld [vmem:[#allocation5 + $0x1b0] sm:$0xff] }
  0x86   :  { %v1671_v26 = vpack.c.bf16 %v171_v24, %v165_v23  ;;  %v177_v29 = vld [vmem:[#allocation5 + $0x1e8] sm:$0xff]  ;;  %v183_v30 = vld [vmem:[#allocation5 + $0x218] sm:$0xff]  ;;  %v176_v31 = vld [vmem:[#allocation5 + $0x1e0] sm:$0xff]  ;;  %v1673_v33 = vpack.c.bf16 %v170_v28, %v164_v27  ;;  %p2436_p4 = pnand %p2435_p3, %p2429_p0 }
  0x87   :  { %1662 = vmatpush1.bf16.msra.mxu0 %v1661_v13  ;;  %v182_v32 = vld [vmem:[#allocation5 + $0x210] sm:$0xff]  ;;  %v189_v34 = vld [vmem:[#allocation5 + $0x248] sm:$0xff]  ;;  %v195_v35 = vld [vmem:[#allocation5 + $0x278] sm:$0xff]  ;;  %v1675_v38 = vpack.c.bf16 %v183_v30, %v177_v29 }
  0x88   :  { %1664 = vmatprep.subr.bf16.mxu0 %v1663_v14  ;;  %v2598_v36 = vld [vmem:[#allocation2 + $0x8] sm:$0xff]  ;;  %v125_v39 = vld [vmem:[#allocation5 + $0x48] sm:$0xff]  ;;  %v118_v40 = vld [vmem:[#allocation5 + $0x10] sm:$0xff]  ;;  %v1677_v51 = vpack.c.bf16 %v182_v32, %v176_v31  ;;  %v1679_v52 = vpack.c.bf16 %v195_v35, %v189_v34 }
  0x89   :  { %v119_v37 = vld [vmem:[#allocation5 + $0x18] sm:$0xff]  ;;  %1581 = vmatprep.mubr.msk.f32.mxu0 %vm292_vm0, %v2598_v36  ;;  %v124_v41 = vld [vmem:[#allocation5 + $0x40] sm:$0xff]  ;;  %v137_v45 = vld [vmem:[#allocation5 + $0xa8] sm:$0xff]  ;;  %1582 = vmatprep.mubr.msk.f32.mxu1 %vm292_vm0, %v2598_v36 }
  0x8a   :  { %v1703_v42 = vpack.c.bf16 %v125_v39, %v119_v37  ;;  %v1705_v43 = vpack.c.bf16 %v124_v41, %v118_v40  ;;  %v131_v44 = vld [vmem:[#allocation5 + $0x78] sm:$0xff]  ;;  %v130_v46 = vld [vmem:[#allocation5 + $0x70] sm:$0xff]  ;;  %v136_v48 = vld [vmem:[#allocation5 + $0xa0] sm:$0xff] }
  0x8b   :  { %1666 = vmatpush1.bf16.msra.mxu0 %v1665_v19  ;;  %v1707_v47 = vpack.c.bf16 %v137_v45, %v131_v44  ;;  %v143_v49 = vld [vmem:[#allocation5 + $0xd8] sm:$0xff]  ;;  %v149_v50 = vld [vmem:[#allocation5 + $0x108] sm:$0xff]  ;;  %v188_v53 = vld [vmem:[#allocation5 + $0x240] sm:$0xff]  ;;  %v1709_v56 = vpack.c.bf16 %v136_v48, %v130_v46 }
  0x8c   :  { %1668 = vmatprep.subr.bf16.mxu0 %v1667_v20  ;;  %1704 = vmatprep.subr.bf16.mxu1 %v1703_v42  ;;  %v194_v54 = vld [vmem:[#allocation5 + $0x270] sm:$0xff]  ;;  %v201_v55 = vld [vmem:[#allocation5 + $0x2a8] sm:$0xff]  ;;  %v207_v57 = vld [vmem:[#allocation5 + $0x2d8] sm:$0xff]  ;;  %v1711_v58 = vpack.c.bf16 %v149_v50, %v143_v49 }
  0x8d   :  { %1706 = vmatpush1.bf16.msra.mxu1 %v1705_v43  ;;  %v142_v59 = vld [vmem:[#allocation5 + $0xd0] sm:$0xff]  ;;  %v148_v60 = vld [vmem:[#allocation5 + $0x100] sm:$0xff]  ;;  %v155_v61 = vld [vmem:[#allocation5 + $0x138] sm:$0xff]  ;;  %v1681_v63 = vpack.c.bf16 %v194_v54, %v188_v53  ;;  %v1683_v0 = vpack.c.bf16 %v207_v57, %v201_v55 }
  0x8e   :  { %1708 = vmatprep.subr.bf16.mxu1 %v1707_v47  ;;  %v161_v62 = vld [vmem:[#allocation5 + $0x168] sm:$0xff]  ;;  %v200_v1 = vld [vmem:[#allocation5 + $0x2a0] sm:$0xff]  ;;  %v206_v2 = vld [vmem:[#allocation5 + $0x2d0] sm:$0xff]  ;;  %v1713_v4 = vpack.c.bf16 %v148_v60, %v142_v59 }
  0x8f   :  { %1670 = vmatpush1.bf16.msra.mxu0 %v1669_v25  ;;  %v213_v3 = vld [vmem:[#allocation5 + $0x308] sm:$0xff]  ;;  %v219_v5 = vld [vmem:[#allocation5 + $0x338] sm:$0xff]  ;;  %v1715_v6 = vpack.c.bf16 %v161_v62, %v155_v61  ;;  %v154_v7 = vld [vmem:[#allocation5 + $0x130] sm:$0xff]  ;;  %v1685_v11 = vpack.c.bf16 %v206_v2, %v200_v1 }
  0x90   :  { %1672 = vmatprep.subr.bf16.mxu0 %v1671_v26  ;;  %v160_v8 = vld [vmem:[#allocation5 + $0x160] sm:$0xff]  ;;  %v167_v9 = vld [vmem:[#allocation5 + $0x198] sm:$0xff]  ;;  %v173_v10 = vld [vmem:[#allocation5 + $0x1c8] sm:$0xff]  ;;  %v1687_v12 = vpack.c.bf16 %v219_v5, %v213_v3 }
  0x91   :  { %1710 = vmatpush1.bf16.msra.mxu1 %v1709_v56  ;;  %v212_v13 = vld [vmem:[#allocation5 + $0x300] sm:$0xff]  ;;  %v218_v14 = vld [vmem:[#allocation5 + $0x330] sm:$0xff]  ;;  %v225_v15 = vld [vmem:[#allocation5 + $0x368] sm:$0xff]  ;;  %v1717_v16 = vpack.c.bf16 %v160_v8, %v154_v7  ;;  %v1719_v18 = vpack.c.bf16 %v173_v10, %v167_v9 }
  0x92   :  { %1712 = vmatprep.subr.bf16.mxu1 %v1711_v58  ;;  %v231_v17 = vld [vmem:[#allocation5 + $0x398] sm:$0xff]  ;;  %v166_v19 = vld [vmem:[#allocation5 + $0x190] sm:$0xff]  ;;  %v172_v20 = vld [vmem:[#allocation5 + $0x1c0] sm:$0xff]  ;;  %v1689_v23 = vpack.c.bf16 %v218_v14, %v212_v13 }
  0x93   :  { %1674 = vmatpush1.bf16.msra.mxu0 %v1673_v33  ;;  %v179_v21 = vld [vmem:[#allocation5 + $0x1f8] sm:$0xff]  ;;  %v185_v22 = vld [vmem:[#allocation5 + $0x228] sm:$0xff]  ;;  %v1691_v24 = vpack.c.bf16 %v231_v17, %v225_v15  ;;  %v224_v25 = vld [vmem:[#allocation5 + $0x360] sm:$0xff]  ;;  %v1721_v28 = vpack.c.bf16 %v172_v20, %v166_v19 }
  0x94   :  { %1676 = vmatprep.subr.bf16.mxu0 %v1675_v38  ;;  %v230_v26 = vld [vmem:[#allocation5 + $0x390] sm:$0xff]  ;;  %v237_v27 = vld [vmem:[#allocation5 + $0x3c8] sm:$0xff]  ;;  %v243_v29 = vld [vmem:[#allocation5 + $0x3f8] sm:$0xff]  ;;  %v1723_v30 = vpack.c.bf16 %v185_v22, %v179_v21 }
  0x95   :  { %1714 = vmatpush1.bf16.msra.mxu1 %v1713_v4  ;;  %v178_v31 = vld [vmem:[#allocation5 + $0x1f0] sm:$0xff]  ;;  %v184_v32 = vld [vmem:[#allocation5 + $0x220] sm:$0xff]  ;;  %v191_v33 = vld [vmem:[#allocation5 + $0x258] sm:$0xff]  ;;  %v1693_v35 = vpack.c.bf16 %v230_v26, %v224_v25  ;;  %v1695_v37 = vpack.c.bf16 %v243_v29, %v237_v27 }
  0x96   :  { %1716 = vmatprep.subr.bf16.mxu1 %v1715_v6  ;;  %v197_v34 = vld [vmem:[#allocation5 + $0x288] sm:$0xff]  ;;  %v236_v38 = vld [vmem:[#allocation5 + $0x3c0] sm:$0xff]  ;;  %v242_v39 = vld [vmem:[#allocation5 + $0x3f0] sm:$0xff]  ;;  %v1725_v41 = vpack.c.bf16 %v184_v32, %v178_v31 }
  0x97   :  { %1678 = vmatpush1.bf16.msra.mxu0 %v1677_v51  ;;  %v249_v40 = vld [vmem:[#allocation5 + $0x428] sm:$0xff]  ;;  %v255_v42 = vld [vmem:[#allocation5 + $0x458] sm:$0xff]  ;;  %v1727_v43 = vpack.c.bf16 %v197_v34, %v191_v33  ;;  %v190_v44 = vld [vmem:[#allocation5 + $0x250] sm:$0xff]  ;;  %v1697_v48 = vpack.c.bf16 %v242_v39, %v236_v38 }
  0x98   :  { %1680 = vmatprep.subr.bf16.mxu0 %v1679_v52  ;;  %v196_v45 = vld [vmem:[#allocation5 + $0x280] sm:$0xff]  ;;  %v203_v46 = vld [vmem:[#allocation5 + $0x2b8] sm:$0xff]  ;;  %v209_v47 = vld [vmem:[#allocation5 + $0x2e8] sm:$0xff]  ;;  %v1699_v49 = vpack.c.bf16 %v255_v42, %v249_v40 }
  0x99   :  { %1718 = vmatpush1.bf16.msra.mxu1 %v1717_v16  ;;  %v248_v50 = vld [vmem:[#allocation5 + $0x420] sm:$0xff]  ;;  %v254_v51 = vld [vmem:[#allocation5 + $0x450] sm:$0xff]  ;;  %v1729_v52 = vpack.c.bf16 %v196_v45, %v190_v44  ;;  %v1731_v54 = vpack.c.bf16 %v209_v47, %v203_v46  ;;  %v121_v56 = vld [vmem:[#allocation5 + $0x28] sm:$0xff] }
  0x9a   :  { %1720 = vmatprep.subr.bf16.mxu1 %v1719_v18  ;;  %v202_v53 = vld [vmem:[#allocation5 + $0x2b0] sm:$0xff]  ;;  %v208_v55 = vld [vmem:[#allocation5 + $0x2e0] sm:$0xff]  ;;  %v127_v57 = vld [vmem:[#allocation5 + $0x58] sm:$0xff]  ;;  %v1701_v60 = vpack.c.bf16 %v254_v51, %v248_v50 }
  0x9b   :  { %1682 = vmatpush1.bf16.msra.mxu0 %v1681_v63  ;;  %v215_v58 = vld [vmem:[#allocation5 + $0x318] sm:$0xff]  ;;  %v221_v59 = vld [vmem:[#allocation5 + $0x348] sm:$0xff]  ;;  %v1733_v61 = vpack.c.bf16 %v208_v55, %v202_v53  ;;  %v214_v62 = vld [vmem:[#allocation5 + $0x310] sm:$0xff]  ;;  %v1751_v63 = vpack.c.bf16 %v127_v57, %v121_v56 }
  0x9c   :  { %1684 = vmatprep.subr.bf16.mxu0 %v1683_v0  ;;  %v120_v0 = vld [vmem:[#allocation5 + $0x20] sm:$0xff]  ;;  %v126_v1 = vld [vmem:[#allocation5 + $0x50] sm:$0xff]  ;;  %v1735_v2 = vpack.c.bf16 %v221_v59, %v215_v58  ;;  %v133_v4 = vld [vmem:[#allocation5 + $0x88] sm:$0xff] }
  0x9d   :  { %1722 = vmatpush1.bf16.msra.mxu1 %v1721_v28  ;;  %v220_v3 = vld [vmem:[#allocation5 + $0x340] sm:$0xff]  ;;  %v139_v5 = vld [vmem:[#allocation5 + $0xb8] sm:$0xff]  ;;  %v233_v7 = vld [vmem:[#allocation5 + $0x3a8] sm:$0xff]  ;;  %v1753_v9 = vpack.c.bf16 %v126_v1, %v120_v0 }
  0x9e   :  { %1724 = vmatprep.subr.bf16.mxu1 %v1723_v30  ;;  %v227_v6 = vld [vmem:[#allocation5 + $0x378] sm:$0xff]  ;;  %v2604_v8 = vld [vmem:[#allocation2] sm:$0xff]  ;;  %v1737_v10 = vpack.c.bf16 %v220_v3, %v214_v62  ;;  %v132_v13 = vld [vmem:[#allocation5 + $0x80] sm:$0xff] }
  0x9f   :  { %1686 = vmatpush1.bf16.msra.mxu0 %v1685_v11  ;;  %v226_v11 = vld [vmem:[#allocation5 + $0x370] sm:$0xff]  ;;  %v1739_v15 = vpack.c.bf16 %v233_v7, %v227_v6  ;;  %v232_v16 = vld [vmem:[#allocation5 + $0x3a0] sm:$0xff]  ;;  %v145_v17 = vld [vmem:[#allocation5 + $0xe8] sm:$0xff] }
  0xa0   :  { %1688 = vmatprep.subr.bf16.mxu0 %v1687_v12  ;;  %v1755_v12 = vpack.c.bf16 %v139_v5, %v133_v4  ;;  %v138_v14 = vld [vmem:[#allocation5 + $0xb0] sm:$0xff]  ;;  %v151_v18 = vld [vmem:[#allocation5 + $0x118] sm:$0xff]  ;;  %v245_v20 = vld [vmem:[#allocation5 + $0x408] sm:$0xff]  ;;  %v1741_v22 = vpack.c.bf16 %v232_v16, %v226_v11 }
  0xa1   :  { %1726 = vmatpush1.bf16.msra.mxu1 %v1725_v41  ;;  %v239_v19 = vld [vmem:[#allocation5 + $0x3d8] sm:$0xff]  ;;  %v1757_v21 = vpack.c.bf16 %v138_v14, %v132_v13  ;;  %v144_v25 = vld [vmem:[#allocation5 + $0xe0] sm:$0xff]  ;;  %v150_v26 = vld [vmem:[#allocation5 + $0x110] sm:$0xff] }
  0xa2   :  { %1728 = vmatprep.subr.bf16.mxu1 %v1727_v43  ;;  %v1743_v27 = vpack.c.bf16 %v245_v20, %v239_v19  ;;  %v244_v28 = vld [vmem:[#allocation5 + $0x400] sm:$0xff]  ;;  %v157_v29 = vld [vmem:[#allocation5 + $0x148] sm:$0xff]  ;;  %v163_v30 = vld [vmem:[#allocation5 + $0x178] sm:$0xff]  ;;  %v1761_v33 = vpack.c.bf16 %v150_v26, %v144_v25 }
  0xa3   :  { %1690 = vmatpush1.bf16.msra.mxu0 %v1689_v23  ;;  %v238_v23 = vld [vmem:[#allocation5 + $0x3d0] sm:$0xff]  ;;  %v251_v31 = vld [vmem:[#allocation5 + $0x438] sm:$0xff]  ;;  %v257_v32 = vld [vmem:[#allocation5 + $0x468] sm:$0xff] }
  0xa4   :  { %1692 = vmatprep.subr.bf16.mxu0 %v1691_v24  ;;  %v1759_v24 = vpack.c.bf16 %v151_v18, %v145_v17  ;;  %v1745_v34 = vpack.c.bf16 %v244_v28, %v238_v23  ;;  %v162_v38 = vld [vmem:[#allocation5 + $0x170] sm:$0xff]  ;;  %v1747_v39 = vpack.c.bf16 %v257_v32, %v251_v31  ;;  %v256_v40 = vld [vmem:[#allocation5 + $0x460] sm:$0xff]  ;;  %v169_v41 = vld [vmem:[#allocation5 + $0x1a8] sm:$0xff] }
  0xa5   :  { %1730 = vmatpush1.bf16.msra.mxu1 %v1729_v52  ;;  %v175_v42 = vld [vmem:[#allocation5 + $0x1d8] sm:$0xff]  ;;  %v516_v43 = vld [vmem:[#allocation8 + $0x8] sm:$0xff]  ;;  %v515_v53 = vld [vmem:[#allocation8] sm:$0xff] }
  0xa6   :  { %1732 = vmatprep.subr.bf16.mxu1 %v1731_v54  ;;  %v520_v44 = vld [vmem:[#allocation8 + $0x28] sm:$0xff]  ;;  %v1767_v47 = vpack.c.bf16 %v175_v42, %v169_v41  ;;  %v187_v51 = vld [vmem:[#allocation5 + $0x238] sm:$0xff]  ;;  %v519_v54 = vld [vmem:[#allocation8 + $0x20] sm:$0xff] }
  0xa7   :  { %1694 = vmatpush1.bf16.msra.mxu0 %v1693_v35  ;;  %v250_v35 = vld [vmem:[#allocation5 + $0x430] sm:$0xff]  ;;  %v181_v50 = vld [vmem:[#allocation5 + $0x208] sm:$0xff]  ;;  %v1799_v52 = vpack.c.bf16 %v520_v44, %v516_v43  ;;  %v180_v59 = vld [vmem:[#allocation5 + $0x200] sm:$0xff]  ;;  %v1801_v62 = vpack.c.bf16 %v519_v54, %v515_v53 }
  0xa8   :  { %1696 = vmatprep.subr.bf16.mxu0 %v1695_v37  ;;  %v156_v37 = vld [vmem:[#allocation5 + $0x140] sm:$0xff]  ;;  %v1749_v46 = vpack.c.bf16 %v256_v40, %v250_v35  ;;  %v524_v55 = vld [vmem:[#allocation8 + $0x48] sm:$0xff]  ;;  %v1771_v58 = vpack.c.bf16 %v187_v51, %v181_v50 }
  0xa9   :  { %1734 = vmatpush1.bf16.msra.mxu1 %v1733_v61  ;;  %v1765_v45 = vpack.c.bf16 %v162_v38, %v156_v37  ;;  %v528_v56 = vld [vmem:[#allocation8 + $0x68] sm:$0xff]  ;;  %v523_v1 = vld [vmem:[#allocation8 + $0x40] sm:$0xff] }
  0xaa   :  { %1736 = vmatprep.subr.bf16.mxu1 %v1735_v2  ;;  %v193_v61 = vld [vmem:[#allocation5 + $0x268] sm:$0xff]  ;;  %v1803_v0 = vpack.c.bf16 %v528_v56, %v524_v55  ;;  %v192_v7 = vld [vmem:[#allocation5 + $0x260] sm:$0xff] }
  0xab   :  { %1698 = vmatpush1.bf16.msra.mxu0 %v1697_v48  ;;  %v168_v48 = vld [vmem:[#allocation5 + $0x1a0] sm:$0xff]  ;;  %v532_v3 = vld [vmem:[#allocation8 + $0x88] sm:$0xff] }
  0xac   :  { %1700 = vmatprep.subr.bf16.mxu0 %v1699_v49  ;;  %v174_v49 = vld [vmem:[#allocation5 + $0x1d0] sm:$0xff]  ;;  %v527_v2 = vld [vmem:[#allocation8 + $0x60] sm:$0xff] }
  0xad   :  { %1738 = vmatpush1.bf16.msra.mxu1 %v1737_v10  ;;  %v1769_v57 = vpack.c.bf16 %v174_v49, %v168_v48  ;;  %v536_v4 = vld [vmem:[#allocation8 + $0xa8] sm:$0xff]  ;;  %v1805_v11 = vpack.c.bf16 %v527_v2, %v523_v1  ;;  %v531_v14 = vld [vmem:[#allocation8 + $0x80] sm:$0xff]  ;;  %v247_v48 = vld [vmem:[#allocation5 + $0x418] sm:$0xff] }
  0xae   :  { %1740 = vmatprep.subr.bf16.mxu1 %v1739_v15  ;;  %v205_v10 = vld [vmem:[#allocation5 + $0x2c8] sm:$0xff]  ;;  %v1807_v13 = vpack.c.bf16 %v536_v4, %v532_v3  ;;  %v204_v20 = vld [vmem:[#allocation5 + $0x2c0] sm:$0xff] }
  0xaf   :  { %1702 = vmatpush1.bf16.msra.mxu0 %v1701_v60  ;;  %v186_v60 = vld [vmem:[#allocation5 + $0x230] sm:$0xff]  ;;  %v535_v15 = vld [vmem:[#allocation8 + $0xa0] sm:$0xff] }
  0xb0   :  { %1752 = vmatprep.subr.bf16.mxu0 %v1751_v63  ;;  %v199_v63 = vld [vmem:[#allocation5 + $0x298] sm:$0xff]  ;;  %v1773_v5 = vpack.c.bf16 %v186_v60, %v180_v59  ;;  %v540_v16 = vld [vmem:[#allocation8 + $0xc8] sm:$0xff]  ;;  %v1809_v23 = vpack.c.bf16 %v535_v15, %v531_v14  ;;  %v539_v26 = vld [vmem:[#allocation8 + $0xc0] sm:$0xff] }
  0xb1   :  { %1742 = vmatpush1.bf16.msra.mxu1 %v1741_v22  ;;  %v1775_v6 = vpack.c.bf16 %v199_v63, %v193_v61  ;;  %v544_v17 = vld [vmem:[#allocation8 + $0xe8] sm:$0xff]  ;;  %v216_v32 = vld [vmem:[#allocation5 + $0x320] sm:$0xff]  ;;  %v259_v60 = vld [vmem:[#allocation5 + $0x478] sm:$0xff] }
  0xb2   :  { %361 = vmatmul.mubr.f32.vlgmr.msra.gmra.mrb[0].mxu0 %v2604_v8  ;;  %1744 = vmatprep.subr.bf16.mxu1 %v1743_v27  ;;  %v217_v22 = vld [vmem:[#allocation5 + $0x328] sm:$0xff]  ;;  %v1811_v25 = vpack.c.bf16 %v544_v17, %v540_v16  ;;  %v228_v44 = vld [vmem:[#allocation5 + $0x380] sm:$0xff]  ;;  %v517_v17 = vld [vmem:[#allocation8 + $0x10] sm:$0xff] }
  0xb3   :  { %1754 = vmatpush1.bf16.msra.mxu0 %v1753_v9  ;;  %1583 = vmatprep.mubr.msk.f32.mxu0 %vm292_vm0, %v2598_v36  ;;  %v1763_v36 = vpack.c.bf16 %v163_v30, %v157_v29  ;;  %v198_v9 = vld [vmem:[#allocation5 + $0x290] sm:$0xff]  ;;  %v543_v27 = vld [vmem:[#allocation8 + $0xe0] sm:$0xff] }
  0xb4   :  { %1756 = vmatprep.subr.bf16.mxu0 %v1755_v12  ;;  %v211_v12 = vld [vmem:[#allocation5 + $0x2f8] sm:$0xff]  ;;  %v1777_v18 = vpack.c.bf16 %v198_v9, %v192_v7  ;;  %v548_v28 = vld [vmem:[#allocation8 + $0x108] sm:$0xff]  ;;  %v1813_v35 = vpack.c.bf16 %v543_v27, %v539_v26  ;;  %v547_v38 = vld [vmem:[#allocation8 + $0x100] sm:$0xff] }
  0xb5   :  { %1746 = vmatpush1.bf16.msra.mxu1 %v1745_v34  ;;  %v1779_v19 = vpack.c.bf16 %v211_v12, %v205_v10  ;;  %v552_v29 = vld [vmem:[#allocation8 + $0x128] sm:$0xff]  ;;  %v555_v50 = vld [vmem:[#allocation8 + $0x140] sm:$0xff]  ;;  %v522_v9 = vld [vmem:[#allocation8 + $0x38] sm:$0xff] }
  0xb6   :  { %1748 = vmatprep.subr.bf16.mxu1 %v1747_v39  ;;  %v229_v34 = vld [vmem:[#allocation5 + $0x388] sm:$0xff]  ;;  %v1815_v37 = vpack.c.bf16 %v552_v29, %v548_v28  ;;  %v240_v56 = vld [vmem:[#allocation5 + $0x3e0] sm:$0xff]  ;;  %v525_v29 = vld [vmem:[#allocation8 + $0x50] sm:$0xff] }
  0xb7   :  { %1758 = vmatpush1.bf16.msra.mxu0 %v1757_v21  ;;  %v210_v21 = vld [vmem:[#allocation5 + $0x2f0] sm:$0xff]  ;;  %v551_v39 = vld [vmem:[#allocation8 + $0x120] sm:$0xff] }
  0xb8   :  { %1760 = vmatprep.subr.bf16.mxu0 %v1759_v24  ;;  %v223_v24 = vld [vmem:[#allocation5 + $0x358] sm:$0xff]  ;;  %v1781_v30 = vpack.c.bf16 %v210_v21, %v204_v20  ;;  %v556_v40 = vld [vmem:[#allocation8 + $0x148] sm:$0xff]  ;;  %v559_v51 = vld [vmem:[#allocation8 + $0x160] sm:$0xff] }
  0xb9   :  { %1750 = vmatpush1.bf16.msra.mxu1 %v1749_v46  ;;  %v1783_v31 = vpack.c.bf16 %v223_v24, %v217_v22  ;;  %v560_v41 = vld [vmem:[#allocation8 + $0x168] sm:$0xff]  ;;  %v1821_v59 = vpack.c.bf16 %v559_v51, %v555_v50  ;;  %v567_v63 = vld [vmem:[#allocation8 + $0x1a0] sm:$0xff]  ;;  %v530_v21 = vld [vmem:[#allocation8 + $0x78] sm:$0xff] }
  0xba   :  { %1800 = vmatprep.subr.bf16.mxu1 %v1799_v52  ;;  %v241_v46 = vld [vmem:[#allocation5 + $0x3e8] sm:$0xff]  ;;  %v1819_v49 = vpack.c.bf16 %v560_v41, %v556_v40  ;;  %v252_v4 = vld [vmem:[#allocation5 + $0x440] sm:$0xff]  ;;  %v533_v41 = vld [vmem:[#allocation8 + $0x90] sm:$0xff] }
  0xbb   :  { %1762 = vmatpush1.bf16.msra.mxu0 %v1761_v33  ;;  %v222_v33 = vld [vmem:[#allocation5 + $0x350] sm:$0xff]  ;;  %v1791_v55 = vpack.c.bf16 %v247_v48, %v241_v46  ;;  %v575_v12 = vld [vmem:[#allocation8 + $0x1e0] sm:$0xff] }
  0xbc   :  { %1764 = vmatprep.subr.bf16.mxu0 %v1763_v36  ;;  %432 = vmatmul.mubr.f32.vlgmr.msra.gmra.mrb[0].mxu1 %v2604_v8  ;;  %v235_v36 = vld [vmem:[#allocation5 + $0x3b8] sm:$0xff]  ;;  %v1785_v42 = vpack.c.bf16 %v222_v33, %v216_v32  ;;  %v564_v52 = vld [vmem:[#allocation8 + $0x188] sm:$0xff]  ;;  %v583_v24 = vld [vmem:[#allocation8 + $0x220] sm:$0xff] }
  0xbd   :  { %1802 = vmatpush1.bf16.msra.mxu1 %v1801_v62  ;;  %v1787_v43 = vpack.c.bf16 %v235_v36, %v229_v34  ;;  %v568_v53 = vld [vmem:[#allocation8 + $0x1a8] sm:$0xff]  ;;  %v563_v62 = vld [vmem:[#allocation8 + $0x180] sm:$0xff]  ;;  %v538_v33 = vld [vmem:[#allocation8 + $0xb8] sm:$0xff] }
  0xbe   :  { %1804 = vmatprep.subr.bf16.mxu1 %v1803_v0  ;;  %v1823_v61 = vpack.c.bf16 %v568_v53, %v564_v52  ;;  %v572_v0 = vld [vmem:[#allocation8 + $0x1c8] sm:$0xff]  ;;  %v1825_v7 = vpack.c.bf16 %v567_v63, %v563_v62  ;;  %v591_v36 = vld [vmem:[#allocation8 + $0x260] sm:$0xff]  ;;  %v541_v52 = vld [vmem:[#allocation8 + $0xd0] sm:$0xff] }
  0xbf   :  { %1766 = vmatpush1.bf16.msra.mxu0 %v1765_v45  ;;  %v234_v45 = vld [vmem:[#allocation5 + $0x3b0] sm:$0xff]  ;;  %v599_v48 = vld [vmem:[#allocation8 + $0x2a0] sm:$0xff] }
  0xc0   :  { %1768 = vmatprep.subr.bf16.mxu0 %v1767_v47  ;;  %v1817_v47 = vpack.c.bf16 %v551_v39, %v547_v38  ;;  %v1789_v54 = vpack.c.bf16 %v234_v45, %v228_v44  ;;  %v576_v1 = vld [vmem:[#allocation8 + $0x1e8] sm:$0xff]  ;;  %v546_v45 = vld [vmem:[#allocation8 + $0xf8] sm:$0xff]  ;;  %v545_v53 = vld [vmem:[#allocation8 + $0xf0] sm:$0xff] }
  0xc1   :  { %1806 = vmatpush1.bf16.msra.mxu1 %v1805_v11  ;;  %v1827_v10 = vpack.c.bf16 %v576_v1, %v572_v0  ;;  %v571_v11 = vld [vmem:[#allocation8 + $0x1c0] sm:$0xff]  ;;  %v584_v14 = vld [vmem:[#allocation8 + $0x228] sm:$0xff]  ;;  %v2005_v62 = vpack.c.bf16 %v545_v53, %v541_v52  ;;  %v549_v0 = vld [vmem:[#allocation8 + $0x110] sm:$0xff] }
  0xc2   :  { %1808 = vmatprep.subr.bf16.mxu1 %v1807_v13  ;;  %v580_v13 = vld [vmem:[#allocation8 + $0x208] sm:$0xff]  ;;  %v1829_v20 = vpack.c.bf16 %v575_v12, %v571_v11  ;;  %v553_v1 = vld [vmem:[#allocation8 + $0x130] sm:$0xff] }
  0xc3   :  { %1770 = vmatpush1.bf16.msra.mxu0 %v1769_v57  ;;  %v246_v57 = vld [vmem:[#allocation5 + $0x410] sm:$0xff]  ;;  %v1831_v22 = vpack.c.bf16 %v584_v14, %v580_v13  ;;  %v2009_v11 = vpack.c.bf16 %v553_v1, %v549_v0 }
  0xc4   :  { %1772 = vmatprep.subr.bf16.mxu0 %v1771_v58  ;;  %v253_v58 = vld [vmem:[#allocation5 + $0x448] sm:$0xff]  ;;  %v1793_v2 = vpack.c.bf16 %v246_v57, %v240_v56  ;;  %v554_v56 = vld [vmem:[#allocation8 + $0x138] sm:$0xff]  ;;  %v557_v13 = vld [vmem:[#allocation8 + $0x150] sm:$0xff] }
  0xc5   :  { %1810 = vmatpush1.bf16.msra.mxu1 %v1809_v23  ;;  %v1795_v3 = vpack.c.bf16 %v259_v60, %v253_v58  ;;  %v579_v23 = vld [vmem:[#allocation8 + $0x200] sm:$0xff]  ;;  %v592_v26 = vld [vmem:[#allocation8 + $0x268] sm:$0xff]  ;;  %v561_v14 = vld [vmem:[#allocation8 + $0x170] sm:$0xff] }
  0xc6   :  { %1812 = vmatprep.subr.bf16.mxu1 %v1811_v25  ;;  %v588_v25 = vld [vmem:[#allocation8 + $0x248] sm:$0xff]  ;;  %v1833_v32 = vpack.c.bf16 %v583_v24, %v579_v23  ;;  %v603_v58 = vld [vmem:[#allocation8 + $0x2c0] sm:$0xff]  ;;  %v2013_v23 = vpack.c.bf16 %v561_v14, %v557_v13  ;;  %v597_v52 = vld [vmem:[#allocation8 + $0x290] sm:$0xff] }
  0xc7   :  { %1774 = vmatpush1.bf16.msra.mxu0 %v1773_v5  ;;  %v258_v5 = vld [vmem:[#allocation5 + $0x470] sm:$0xff]  ;;  %v1835_v34 = vpack.c.bf16 %v592_v26, %v588_v25  ;;  %v622_v13 = vld [vmem:[#allocation8 + $0x358] sm:$0xff] }
  0xc8   :  { %1776 = vmatprep.subr.bf16.mxu0 %v1775_v6  ;;  %v518_v6 = vld [vmem:[#allocation8 + $0x18] sm:$0xff]  ;;  %v1797_v15 = vpack.c.bf16 %v258_v5, %v252_v4  ;;  %v600_v38 = vld [vmem:[#allocation8 + $0x2a8] sm:$0xff]  ;;  %v565_v25 = vld [vmem:[#allocation8 + $0x190] sm:$0xff] }
  0xc9   :  { %1814 = vmatpush1.bf16.msra.mxu1 %v1813_v35  ;;  %v1991_v16 = vpack.c.bf16 %v522_v9, %v518_v6  ;;  %v587_v35 = vld [vmem:[#allocation8 + $0x240] sm:$0xff]  ;;  %v608_v50 = vld [vmem:[#allocation8 + $0x2e8] sm:$0xff]  ;;  %v562_v4 = vld [vmem:[#allocation8 + $0x178] sm:$0xff] }
  0xca   :  { %1816 = vmatprep.subr.bf16.mxu1 %v1815_v37  ;;  %v596_v37 = vld [vmem:[#allocation8 + $0x288] sm:$0xff]  ;;  %v1837_v44 = vpack.c.bf16 %v591_v36, %v587_v35  ;;  %v611_v6 = vld [vmem:[#allocation8 + $0x300] sm:$0xff]  ;;  %v569_v26 = vld [vmem:[#allocation8 + $0x1b0] sm:$0xff] }
  0xcb   :  { %1778 = vmatpush1.bf16.msra.mxu0 %v1777_v18  ;;  %v521_v18 = vld [vmem:[#allocation8 + $0x30] sm:$0xff]  ;;  %v1839_v46 = vpack.c.bf16 %v600_v38, %v596_v37  ;;  %v612_v60 = vld [vmem:[#allocation8 + $0x308] sm:$0xff]  ;;  %v582_v38 = vld [vmem:[#allocation8 + $0x218] sm:$0xff] }
  0xcc   :  { %1780 = vmatprep.subr.bf16.mxu0 %v1779_v19  ;;  %v526_v19 = vld [vmem:[#allocation8 + $0x58] sm:$0xff]  ;;  %v1993_v27 = vpack.c.bf16 %v521_v18, %v517_v17  ;;  %v620_v9 = vld [vmem:[#allocation8 + $0x348] sm:$0xff]  ;;  %v573_v35 = vld [vmem:[#allocation8 + $0x1d0] sm:$0xff] }
  0xcd   :  { %1818 = vmatpush1.bf16.msra.mxu1 %v1817_v47  ;;  %v1995_v28 = vpack.c.bf16 %v530_v21, %v526_v19  ;;  %v595_v47 = vld [vmem:[#allocation8 + $0x280] sm:$0xff]  ;;  %v570_v17 = vld [vmem:[#allocation8 + $0x1b8] sm:$0xff]  ;;  %v628_v21 = vld [vmem:[#allocation8 + $0x388] sm:$0xff] }
  0xce   :  { %1820 = vmatprep.subr.bf16.mxu1 %v1819_v49  ;;  %v604_v49 = vld [vmem:[#allocation8 + $0x2c8] sm:$0xff]  ;;  %v619_v19 = vld [vmem:[#allocation8 + $0x340] sm:$0xff]  ;;  %v577_v36 = vld [vmem:[#allocation8 + $0x1f0] sm:$0xff] }
  0xcf   :  { %1782 = vmatpush1.bf16.msra.mxu0 %v1781_v30  ;;  %v529_v30 = vld [vmem:[#allocation8 + $0x70] sm:$0xff]  ;;  %v1843_v57 = vpack.c.bf16 %v608_v50, %v604_v49  ;;  %v598_v50 = vld [vmem:[#allocation8 + $0x298] sm:$0xff] }
  0xd0   :  { %1784 = vmatprep.subr.bf16.mxu0 %v1783_v31  ;;  %v534_v31 = vld [vmem:[#allocation8 + $0x98] sm:$0xff]  ;;  %v1997_v39 = vpack.c.bf16 %v529_v30, %v525_v29  ;;  %v593_v49 = vld [vmem:[#allocation8 + $0x270] sm:$0xff] }
  0xd1   :  { %1822 = vmatpush1.bf16.msra.mxu1 %v1821_v59  ;;  %v1999_v40 = vpack.c.bf16 %v538_v33, %v534_v31  ;;  %v607_v59 = vld [vmem:[#allocation8 + $0x2e0] sm:$0xff]  ;;  %v578_v29 = vld [vmem:[#allocation8 + $0x1f8] sm:$0xff]  ;;  %v2017_v33 = vpack.c.bf16 %v569_v26, %v565_v25  ;;  %v601_v53 = vld [vmem:[#allocation8 + $0x2b0] sm:$0xff] }
  0xd2   :  { %1824 = vmatprep.subr.bf16.mxu1 %v1823_v61  ;;  %v616_v61 = vld [vmem:[#allocation8 + $0x328] sm:$0xff]  ;;  %v627_v31 = vld [vmem:[#allocation8 + $0x380] sm:$0xff]  ;;  %v605_v0 = vld [vmem:[#allocation8 + $0x2d0] sm:$0xff] }
  0xd3   :  { %1786 = vmatpush1.bf16.msra.mxu0 %v1785_v42  ;;  %v537_v42 = vld [vmem:[#allocation8 + $0xb0] sm:$0xff]  ;;  %v1847_v5 = vpack.c.bf16 %v616_v61, %v612_v60  ;;  %v635_v60 = vld [vmem:[#allocation8 + $0x3c0] sm:$0xff]  ;;  %v626_v14 = vld [vmem:[#allocation8 + $0x378] sm:$0xff] }
  0xd4   :  { %1788 = vmatprep.subr.bf16.mxu0 %v1787_v43  ;;  %v542_v43 = vld [vmem:[#allocation8 + $0xd8] sm:$0xff]  ;;  %v639_v61 = vld [vmem:[#allocation8 + $0x3e0] sm:$0xff] }
  0xd5   :  { %1826 = vmatpush1.bf16.msra.mxu1 %v1825_v7  ;;  %v2003_v51 = vpack.c.bf16 %v546_v45, %v542_v43  ;;  %v615_v7 = vld [vmem:[#allocation8 + $0x320] sm:$0xff]  ;;  %v585_v43 = vld [vmem:[#allocation8 + $0x230] sm:$0xff]  ;;  %v594_v45 = vld [vmem:[#allocation8 + $0x278] sm:$0xff] }
  0xd6   :  { %1828 = vmatprep.subr.bf16.mxu1 %v1827_v10  ;;  %v624_v10 = vld [vmem:[#allocation8 + $0x368] sm:$0xff]  ;;  %v638_v25 = vld [vmem:[#allocation8 + $0x3d8] sm:$0xff] }
  0xd7   :  { %1790 = vmatpush1.bf16.msra.mxu0 %v1789_v54  ;;  %v550_v54 = vld [vmem:[#allocation8 + $0x118] sm:$0xff]  ;;  %v1851_v18 = vpack.c.bf16 %v624_v10, %v620_v9 }
  0xd8   :  { %1792 = vmatprep.subr.bf16.mxu0 %v1791_v55  ;;  %v1841_v55 = vpack.c.bf16 %v599_v48, %v595_v47  ;;  %v2007_v63 = vpack.c.bf16 %v554_v56, %v550_v54  ;;  %v589_v48 = vld [vmem:[#allocation8 + $0x250] sm:$0xff]  ;;  %v636_v56 = vld [vmem:[#allocation8 + $0x3c8] sm:$0xff]  ;;  %v642_v26 = vld [vmem:[#allocation8 + $0x3f8] sm:$0xff] }
  0xd9   :  { %1830 = vmatpush1.bf16.msra.mxu1 %v1829_v20  ;;  %v623_v20 = vld [vmem:[#allocation8 + $0x360] sm:$0xff] }
  0xda   :  { %1832 = vmatprep.subr.bf16.mxu1 %v1831_v22  ;;  %v632_v22 = vld [vmem:[#allocation8 + $0x3a8] sm:$0xff] }
  0xdb   :  { %1794 = vmatpush1.bf16.msra.mxu0 %v1793_v2  ;;  %v558_v2 = vld [vmem:[#allocation8 + $0x158] sm:$0xff]  ;;  %v1855_v30 = vpack.c.bf16 %v632_v22, %v628_v21 }
  0xdc   :  { %1796 = vmatprep.subr.bf16.mxu0 %v1795_v3  ;;  %v1845_v3 = vpack.c.bf16 %v607_v59, %v603_v58  ;;  %v2011_v12 = vpack.c.bf16 %v562_v4, %v558_v2  ;;  %v610_v58 = vld [vmem:[#allocation8 + $0x2f8] sm:$0xff]  ;;  %v609_v2 = vld [vmem:[#allocation8 + $0x2f0] sm:$0xff]  ;;  %v648_v4 = vld [vmem:[#allocation8 + $0x428] sm:$0xff] }
  0xdd   :  { %1834 = vmatpush1.bf16.msra.mxu1 %v1833_v32  ;;  %v631_v32 = vld [vmem:[#allocation8 + $0x3a0] sm:$0xff]  ;;  %v2037_v9 = vpack.c.bf16 %v609_v2, %v605_v0  ;;  %v664_v0 = vld [vmem:[#allocation8 + $0x4a8] sm:$0xff]  ;;  %v666_v2 = vld [vmem:[#allocation8 + $0x4b8] sm:$0xff] }
  0xde   :  { %1836 = vmatprep.subr.bf16.mxu1 %v1835_v34  ;;  %v1857_v37 = vpack.c.bf16 %v631_v32, %v627_v31  ;;  %v646_v31 = vld [vmem:[#allocation8 + $0x418] sm:$0xff] }
  0xdf   :  { %1798 = vmatpush1.bf16.msra.mxu0 %v1797_v15  ;;  %v566_v15 = vld [vmem:[#allocation8 + $0x198] sm:$0xff] }
  0xe0   :  { %1992 = vmatprep.subr.bf16.mxu0 %v1991_v16  ;;  %v1849_v16 = vpack.c.bf16 %v615_v7, %v611_v6  ;;  %v2015_v24 = vpack.c.bf16 %v570_v17, %v566_v15  ;;  %v618_v6 = vld [vmem:[#allocation8 + $0x338] sm:$0xff]  ;;  %v621_v17 = vld [vmem:[#allocation8 + $0x350] sm:$0xff] }
  0xe1   :  { %1838 = vmatpush1.bf16.msra.mxu1 %v1837_v44  ;;  %v590_v44 = vld [vmem:[#allocation8 + $0x258] sm:$0xff] }
  0xe2   :  { %503 = vmatmul.mubr.f32.vlgmr.msra.gmra.mrb[2].mxu0 %v2604_v8  ;;  %v2001_v8 = vpack.c.bf16 %v537_v42, %v533_v41  ;;  %1840 = vmatprep.subr.bf16.mxu1 %v1839_v46  ;;  %v581_v42 = vld [vmem:[#allocation8 + $0x210] sm:$0xff]  ;;  %v2027_v47 = vpack.c.bf16 %v594_v45, %v590_v44  ;;  %v650_v32 = vld [vmem:[#allocation8 + $0x438] sm:$0xff]  ;;  %v647_v44 = vld [vmem:[#allocation8 + $0x420] sm:$0xff] }
  0xe3   :  { %1994 = vmatpush1.bf16.msra.mxu0 %v1993_v27  ;;  %v574_v27 = vld [vmem:[#allocation8 + $0x1d8] sm:$0xff]  ;;  %v2025_v46 = vpack.c.bf16 %v585_v43, %v581_v42  ;;  %v643_v43 = vld [vmem:[#allocation8 + $0x400] sm:$0xff] }
  0xe4   :  { %1996 = vmatprep.subr.bf16.mxu0 %v1995_v28  ;;  %v1853_v28 = vpack.c.bf16 %v623_v20, %v619_v19  ;;  %v2019_v34 = vpack.c.bf16 %v578_v29, %v574_v27  ;;  %v630_v19 = vld [vmem:[#allocation8 + $0x398] sm:$0xff]  ;;  %v637_v29 = vld [vmem:[#allocation8 + $0x3d0] sm:$0xff] }
  0xe5   :  { %1842 = vmatpush1.bf16.msra.mxu1 %v1841_v55  ;;  %v606_v55 = vld [vmem:[#allocation8 + $0x2d8] sm:$0xff] }
  0xe6   :  { %1844 = vmatprep.subr.bf16.mxu1 %v1843_v57  ;;  %v640_v57 = vld [vmem:[#allocation8 + $0x3e8] sm:$0xff]  ;;  %v2035_v1 = vpack.c.bf16 %v610_v58, %v606_v55  ;;  %v634_v20 = vld [vmem:[#allocation8 + $0x3b8] sm:$0xff] }
  0xe7   :  { %1998 = vmatpush1.bf16.msra.mxu0 %v1997_v39  ;;  %v586_v39 = vld [vmem:[#allocation8 + $0x238] sm:$0xff]  ;;  %v1859_v59 = vpack.c.bf16 %v640_v57, %v636_v56  ;;  %v2047_v22 = vpack.c.bf16 %v634_v20, %v630_v19  ;;  %v651_v56 = vld [vmem:[#allocation8 + $0x440] sm:$0xff] }
  0xe8   :  { %2000 = vmatprep.subr.bf16.mxu0 %v1999_v40  ;;  %v2021_v40 = vpack.c.bf16 %v577_v36, %v573_v35  ;;  %v2023_v41 = vpack.c.bf16 %v586_v39, %v582_v38  ;;  %v262_v35 = vlaneseq  ;;  %v2614_v38 = vld [vmem:[#allocation7] sm:$0x3f]  ;;  %v655_v57 = vld [vmem:[#allocation8 + $0x460] sm:$0xff] }
  0xe9   :  { %1846 = vmatpush1.bf16.msra.mxu1 %v1845_v3  ;;  %v644_v3 = vld [vmem:[#allocation8 + $0x408] sm:$0xff]  ;;  %v667_v19 = vld [vmem:[#allocation8 + $0x4c0] sm:$0xff] }
  0xea   :  { %1848 = vmatprep.subr.bf16.mxu1 %v1847_v5  ;;  %v614_v5 = vld [vmem:[#allocation8 + $0x318] sm:$0xff]  ;;  %v1863_v7 = vpack.c.bf16 %v648_v4, %v644_v3  ;;  %v2611_v36 = vshrl.u32 %v262_v35, 7  ;;  %v1869_v3 = vpack.c.bf16 %v655_v57, %v651_v56  ;;  %v671_v20 = vld [vmem:[#allocation8 + $0x4e0] sm:$0xff]  ;;  %v692_v56 = vld [vmem:[#allocation8 + $0x588] sm:$0xff] }
  0xeb   :  { %2002 = vmatpush1.bf16.msra.mxu0 %v2001_v8  ;;  %v602_v8 = vld [vmem:[#allocation8 + $0x2b8] sm:$0xff]  ;;  %v2039_v10 = vpack.c.bf16 %v618_v6, %v614_v5  ;;  %v659_v5 = vld [vmem:[#allocation8 + $0x480] sm:$0xff] }
  0xec   :  { %2004 = vmatprep.subr.bf16.mxu0 %v2003_v51  ;;  %v2029_v51 = vpack.c.bf16 %v593_v49, %v589_v48  ;;  %v2031_v54 = vpack.c.bf16 %v602_v8, %v598_v50  ;;  %v268_v39 = vsub.s32 1, %v2611_v36  ;;  %v649_v48 = vld [vmem:[#allocation8 + $0x430] sm:$0xff]  ;;  %v652_v49 = vld [vmem:[#allocation8 + $0x448] sm:$0xff]  ;;  %v663_v6 = vld [vmem:[#allocation8 + $0x4a0] sm:$0xff] }
  0xed   :  { %1850 = vmatpush1.bf16.msra.mxu1 %v1849_v16  ;;  %v2043_v16 = vpack.c.bf16 %v626_v14, %v622_v13  ;;  %v656_v8 = vld [vmem:[#allocation8 + $0x468] sm:$0xff]  ;;  %v670_v14 = vld [vmem:[#allocation8 + $0x4d8] sm:$0xff] }
  0xee   :  { %1852 = vmatprep.subr.bf16.mxu1 %v1851_v18  ;;  %v625_v18 = vld [vmem:[#allocation8 + $0x370] sm:$0xff]  ;;  %v672_v13 = vld [vmem:[#allocation8 + $0x4e8] sm:$0xff] }
  0xef   :  { %2006 = vmatpush1.bf16.msra.mxu0 %v2005_v62  ;;  %v1861_v62 = vpack.c.bf16 %v639_v61, %v635_v60  ;;  %v2045_v21 = vpack.c.bf16 %v625_v18, %v621_v17  ;;  %v653_v61 = vld [vmem:[#allocation8 + $0x450] sm:$0xff]  ;;  %v1873_v17 = vpack.c.bf16 %v663_v6, %v659_v5  ;;  %v700_v5 = vld [vmem:[#allocation8 + $0x5c8] sm:$0xff] }
  0xf0   :  { %2008 = vmatprep.subr.bf16.mxu0 %v2007_v63  ;;  %v2033_v63 = vpack.c.bf16 %v601_v53, %v597_v52  ;;  %v658_v52 = vld [vmem:[#allocation8 + $0x478] sm:$0xff]  ;;  %v704_v6 = vld [vmem:[#allocation8 + $0x5e8] sm:$0xff] }
  0xf1   :  { %1854 = vmatpush1.bf16.msra.mxu1 %v1853_v28  ;;  %v2051_v28 = vpack.c.bf16 %v642_v26, %v638_v25  ;;  %v676_v25 = vld [vmem:[#allocation8 + $0x508] sm:$0xff] }
  0xf2   :  { %1856 = vmatprep.subr.bf16.mxu1 %v1855_v30  ;;  %v641_v30 = vld [vmem:[#allocation8 + $0x3f0] sm:$0xff]  ;;  %v680_v26 = vld [vmem:[#allocation8 + $0x528] sm:$0xff] }
  0xf3   :  { %2010 = vmatpush1.bf16.msra.mxu0 %v2009_v11  ;;  %v613_v11 = vld [vmem:[#allocation8 + $0x310] sm:$0xff] }
  0xf4   :  { %2012 = vmatprep.subr.bf16.mxu0 %v2011_v12  ;;  %v617_v12 = vld [vmem:[#allocation8 + $0x330] sm:$0xff] }
  0xf5   :  { %1858 = vmatpush1.bf16.msra.mxu1 %v1857_v37  ;;  %v2041_v15 = vpack.c.bf16 %v617_v12, %v613_v11  ;;  %v264_v37 = vsub.s32 0, %v2611_v36  ;;  %v665_v11 = vld [vmem:[#allocation8 + $0x4b0] sm:$0xff]  ;;  %v668_v12 = vld [vmem:[#allocation8 + $0x4c8] sm:$0xff] }
  0xf6   :  { %1860 = vmatprep.subr.bf16.mxu1 %v1859_v59  ;;  %v1867_v59 = vpack.c.bf16 %v656_v8, %v652_v49  ;;  %v683_v8 = vld [vmem:[#allocation8 + $0x540] sm:$0xff] }
  0xf7   :  { %2014 = vmatpush1.bf16.msra.mxu0 %v2013_v23  ;;  %v629_v23 = vld [vmem:[#allocation8 + $0x390] sm:$0xff] }
  0xf8   :  { %2016 = vmatprep.subr.bf16.mxu0 %v2015_v24  ;;  %v633_v24 = vld [vmem:[#allocation8 + $0x3b0] sm:$0xff] }
  0xf9   :  { %1862 = vmatpush1.bf16.msra.mxu1 %v1861_v62  ;;  %v2049_v27 = vpack.c.bf16 %v633_v24, %v629_v23  ;;  %v657_v62 = vld [vmem:[#allocation8 + $0x470] sm:$0xff] }
  0xfa   :  { %1864 = vmatprep.subr.bf16.mxu1 %v1863_v7  ;;  %v2061_v4 = vpack.c.bf16 %v657_v62, %v653_v61  ;;  %v669_v23 = vld [vmem:[#allocation8 + $0x4d0] sm:$0xff] }
  0xfb   :  { %2018 = vmatpush1.bf16.msra.mxu0 %v2017_v33  ;;  %v2053_v33 = vpack.c.bf16 %v641_v30, %v637_v29  ;;  %v673_v24 = vld [vmem:[#allocation8 + $0x4f0] sm:$0xff]  ;;  %v1877_v30 = vpack.c.bf16 %v671_v20, %v667_v19  ;;  %v708_v19 = vld [vmem:[#allocation8 + $0x608] sm:$0xff] }
  0xfc   :  { %2020 = vmatprep.subr.bf16.mxu0 %v2019_v34  ;;  %v2055_v34 = vpack.c.bf16 %v650_v32, %v646_v31  ;;  %v2069_v31 = vpack.c.bf16 %v673_v24, %v669_v23  ;;  %v675_v32 = vld [vmem:[#allocation8 + $0x500] sm:$0xff]  ;;  %v712_v20 = vld [vmem:[#allocation8 + $0x628] sm:$0xff] }
  0xff   :  { %2022 = vmatpush1.bf16.msra.mxu0 %v2021_v40  ;;  %v265_v40 = vrot.slane %v2614_v38, %v264_v37 }
 0x100   :  { %2024 = vmatprep.subr.bf16.mxu0 %v2023_v41  ;;  %v269_v41 = vrot.slane %v2614_v38, %v268_v39 }
 0x103   :  { %2026 = vmatpush1.bf16.msra.mxu0 %v2025_v46 }
 0x104   :  { %2028 = vmatprep.subr.bf16.mxu0 %v2027_v47  ;;  %v645_v47 = vld [vmem:[#allocation8 + $0x410] sm:$0xff] }
 0x105   :  { %v2057_v55 = vpack.c.bf16 %v649_v48, %v645_v47 }
 0x107   :  { %2030 = vmatpush1.bf16.msra.mxu0 %v2029_v51  ;;  %v654_v51 = vld [vmem:[#allocation8 + $0x458] sm:$0xff] }
 0x108   :  { %2032 = vmatprep.subr.bf16.mxu0 %v2031_v54  ;;  %v1865_v54 = vpack.c.bf16 %v647_v44, %v643_v43  ;;  %v2059_v60 = vpack.c.bf16 %v658_v52, %v654_v51  ;;  %v688_v44 = vld [vmem:[#allocation8 + $0x568] sm:$0xff]  ;;  %v687_v51 = vld [vmem:[#allocation8 + $0x560] sm:$0xff] }
 0x109   :  { %v1885_v61 = vpack.c.bf16 %v687_v51, %v683_v8  ;;  %v730_v8 = vld [vmem:[#allocation8 + $0x6b8] sm:$0xff] }
 0x10b   :  { %2034 = vmatpush1.bf16.msra.mxu0 %v2033_v63  ;;  %v660_v63 = vld [vmem:[#allocation8 + $0x488] sm:$0xff] }
 0x10c   :  { %2036 = vmatprep.subr.bf16.mxu0 %v2035_v1  ;;  %v662_v1 = vld [vmem:[#allocation8 + $0x498] sm:$0xff]  ;;  %v1871_v7 = vpack.c.bf16 %v664_v0, %v660_v63  ;;  %v691_v63 = vld [vmem:[#allocation8 + $0x580] sm:$0xff] }
 0x10d   :  { %v695_v0 = vld [vmem:[#allocation8 + $0x5a0] sm:$0xff] }
 0x10f   :  { %2038 = vmatpush1.bf16.msra.mxu0 %v2037_v9  ;;  %v2063_v9 = vpack.c.bf16 %v666_v2, %v662_v1 }
 0x110   :  { %2040 = vmatprep.subr.bf16.mxu0 %v2039_v10  ;;  %v661_v10 = vld [vmem:[#allocation8 + $0x490] sm:$0xff] }
 0x111   :  { %v2065_v18 = vpack.c.bf16 %v665_v11, %v661_v10  ;;  %v1889_v10 = vpack.c.bf16 %v695_v0, %v691_v63 }
 0x113   :  { %2042 = vmatpush1.bf16.msra.mxu0 %v2041_v15  ;;  %v674_v15 = vld [vmem:[#allocation8 + $0x4f8] sm:$0xff] }
 0x114   :  { %2044 = vmatprep.subr.bf16.mxu0 %v2043_v16  ;;  %v276_v16 = vsub.s32 3, %v2611_v36 }
 0x116   :  { %v277_v29 = vrot.slane %v2614_v38, %v276_v16 }
 0x117   :  { %2046 = vmatpush1.bf16.msra.mxu0 %v2045_v21  ;;  %v1875_v21 = vpack.c.bf16 %v672_v13, %v668_v12  ;;  %v699_v12 = vld [vmem:[#allocation8 + $0x5c0] sm:$0xff] }
 0x118   :  { %2048 = vmatprep.subr.bf16.mxu0 %v2047_v22  ;;  %v2067_v22 = vpack.c.bf16 %v674_v15, %v670_v14  ;;  %v703_v13 = vld [vmem:[#allocation8 + $0x5e0] sm:$0xff]  ;;  %v1891_v14 = vpack.c.bf16 %v704_v6, %v700_v5  ;;  %v733_v5 = vld [vmem:[#allocation8 + $0x6d0] sm:$0xff] }
 0x119   :  { %v1893_v23 = vpack.c.bf16 %v703_v13, %v699_v12  ;;  %v737_v6 = vld [vmem:[#allocation8 + $0x6f0] sm:$0xff] }
 0x11a   :  { %v2101_v13 = vpack.c.bf16 %v737_v6, %v733_v5  ;;  %v778_v5 = vld [vmem:[#allocation8 + $0x838] sm:$0xff] }
 0x11b   :  { %2050 = vmatpush1.bf16.msra.mxu0 %v2049_v27  ;;  %v678_v27 = vld [vmem:[#allocation8 + $0x518] sm:$0xff] }
 0x11c   :  { %2052 = vmatprep.subr.bf16.mxu0 %v2051_v28  ;;  %v682_v28 = vld [vmem:[#allocation8 + $0x538] sm:$0xff] }
 0x11d   :  { %v2071_v35 = vpack.c.bf16 %v682_v28, %v678_v27  ;;  %v1895_v27 = vpack.c.bf16 %v712_v20, %v708_v19  ;;  %v741_v20 = vld [vmem:[#allocation8 + $0x710] sm:$0xff] }
 0x11f   :  { %2054 = vmatpush1.bf16.msra.mxu0 %v2053_v33  ;;  %v679_v33 = vld [vmem:[#allocation8 + $0x520] sm:$0xff] }
 0x120   :  { %2056 = vmatprep.subr.bf16.mxu0 %v2055_v34  ;;  %v1879_v34 = vpack.c.bf16 %v680_v26, %v676_v25  ;;  %v1881_v49 = vpack.c.bf16 %v679_v33, %v675_v32  ;;  %v707_v25 = vld [vmem:[#allocation8 + $0x600] sm:$0xff]  ;;  %v720_v32 = vld [vmem:[#allocation8 + $0x668] sm:$0xff]  ;;  %v718_v33 = vld [vmem:[#allocation8 + $0x658] sm:$0xff] }
 0x121   :  { %v711_v26 = vld [vmem:[#allocation8 + $0x620] sm:$0xff] }
 0x185   :  { %v362_v42 = vpop.f32.mrb[0].mxu0 }
 0x186   :  { %v363_v45 = vadd.f32 %v362_v42, %v265_v40  ;;  %v364_v46 = vpop.f32.mrb[1].mxu0  ;;  %v677_v40 = vld [vmem:[#allocation8 + $0x510] sm:$0xff]  ;;  %v684_v42 = vld [vmem:[#allocation8 + $0x548] sm:$0xff] }
 0x187   :  { %v365_v50 = vadd.f32 %v364_v46, %v269_v41  ;;  %v681_v41 = vld [vmem:[#allocation8 + $0x530] sm:$0xff]  ;;  %v690_v46 = vld [vmem:[#allocation8 + $0x578] sm:$0xff]  ;;  %v1883_v52 = vpack.c.bf16 %v688_v44, %v684_v42  ;;  %v719_v42 = vld [vmem:[#allocation8 + $0x660] sm:$0xff] }
 0x188   :  { %v509_v58 = vmax.f32 %v363_v45, 0.0  ;;  %v686_v45 = vld [vmem:[#allocation8 + $0x558] sm:$0xff] }
 0x189   :  { %v510_v53 = vmax.f32 %v365_v50, 0.0  ;;  %v2073_v50 = vpack.c.bf16 %v681_v41, %v677_v40  ;;  %v715_v41 = vld [vmem:[#allocation8 + $0x640] sm:$0xff] }
 0x18a   :  { %v1901_v51 = vpack.c.bf16 %v719_v42, %v715_v41  ;;  %v758_v41 = vld [vmem:[#allocation8 + $0x798] sm:$0xff] }
 0x18b   :  { %985 = vmatprep.mubr.f32.mxu1 %v510_v53  ;;  %1198 = vmatprep.mubr.f32.mxu0 %v510_v53  ;;  %v2075_v53 = vpack.c.bf16 %v690_v46, %v686_v45  ;;  %v717_v46 = vld [vmem:[#allocation8 + $0x650] sm:$0xff]  ;;  %v762_v42 = vld [vmem:[#allocation8 + $0x7b8] sm:$0xff] }
 0x18c   :  { %986 = vmatmul.mubr.f32.vlgmr.msra.gmra.mrb[2].mxu1 %v509_v58  ;;  %1199 = vmatmul.mubr.f32.vlgmr.msra.gmra.mrb[4].mxu0 %v509_v58  ;;  %v696_v58 = vld [vmem:[#allocation8 + $0x5a8] sm:$0xff] }
 0x18d   :  { %1866 = vmatpush1.bf16.msra.mxu1 %v1865_v54  ;;  %2058 = vmatpush1.bf16.msra.mxu0 %v2057_v55  ;;  %v685_v54 = vld [vmem:[#allocation8 + $0x550] sm:$0xff]  ;;  %v1887_v1 = vpack.c.bf16 %v696_v58, %v692_v56 }
 0x18e   :  { %1868 = vmatprep.subr.bf16.mxu1 %v1867_v59  ;;  %2060 = vmatprep.subr.bf16.mxu0 %v2059_v60  ;;  %v689_v55 = vld [vmem:[#allocation8 + $0x570] sm:$0xff]  ;;  %v694_v59 = vld [vmem:[#allocation8 + $0x598] sm:$0xff] }
 0x18f   :  { %v2627_v43 = vpop.f32.mrb[0].mxu1  ;;  %v698_v60 = vld [vmem:[#allocation8 + $0x5b8] sm:$0xff]  ;;  %v2077_v62 = vpack.c.bf16 %v689_v55, %v685_v54  ;;  %v727_v54 = vld [vmem:[#allocation8 + $0x6a0] sm:$0xff]  ;;  %v729_v58 = vld [vmem:[#allocation8 + $0x6b0] sm:$0xff] }
 0x190   :  { %v435_v47 = vpop.f32.mrb[1].mxu1  ;;  %v2079_v2 = vpack.c.bf16 %v698_v60, %v694_v59  ;;  %v732_v59 = vld [vmem:[#allocation8 + $0x6c8] sm:$0xff] }
 0x191   :  { %1870 = vmatpush1.bf16.msra.mxu1 %v1869_v3  ;;  %2062 = vmatpush1.bf16.msra.mxu0 %v2061_v4  ;;  %v436_v48 = vadd.f32 %v435_v47, %v277_v29  ;;  %v693_v3 = vld [vmem:[#allocation8 + $0x590] sm:$0xff]  ;;  %v736_v60 = vld [vmem:[#allocation8 + $0x6e8] sm:$0xff] }
 0x192   :  { %1872 = vmatprep.subr.bf16.mxu1 %v1871_v7  ;;  %2064 = vmatprep.subr.bf16.mxu0 %v2063_v9  ;;  %v697_v4 = vld [vmem:[#allocation8 + $0x5b0] sm:$0xff]  ;;  %v702_v7 = vld [vmem:[#allocation8 + $0x5d8] sm:$0xff] }
 0x193   :  { %v512_v57 = vmax.f32 %v436_v48, 0.0  ;;  %v706_v9 = vld [vmem:[#allocation8 + $0x5f8] sm:$0xff]  ;;  %v2081_v11 = vpack.c.bf16 %v697_v4, %v693_v3  ;;  %v709_v29 = vld [vmem:[#allocation8 + $0x610] sm:$0xff]  ;;  %v724_v48 = vld [vmem:[#allocation8 + $0x688] sm:$0xff]  ;;  %v1907_v3 = vpack.c.bf16 %v736_v60, %v732_v59 }
 0x194   :  { %v2083_v15 = vpack.c.bf16 %v706_v9, %v702_v7  ;;  %v721_v47 = vld [vmem:[#allocation8 + $0x670] sm:$0xff]  ;;  %v740_v7 = vld [vmem:[#allocation8 + $0x708] sm:$0xff]  ;;  %v763_v60 = vld [vmem:[#allocation8 + $0x7c0] sm:$0xff] }
 0x195   :  { %1874 = vmatpush1.bf16.msra.mxu1 %v1873_v17  ;;  %2066 = vmatpush1.bf16.msra.mxu0 %v2065_v18  ;;  %v701_v17 = vld [vmem:[#allocation8 + $0x5d0] sm:$0xff]  ;;  %v744_v9 = vld [vmem:[#allocation8 + $0x728] sm:$0xff] }
 0x196   :  { %1876 = vmatprep.subr.bf16.mxu1 %v1875_v21  ;;  %2068 = vmatprep.subr.bf16.mxu0 %v2067_v22  ;;  %v705_v18 = vld [vmem:[#allocation8 + $0x5f0] sm:$0xff]  ;;  %v710_v21 = vld [vmem:[#allocation8 + $0x618] sm:$0xff] }
 0x197   :  { %1056 = vmatprep.mubr.f32.mxu1 %v512_v57  ;;  %1269 = vmatprep.mubr.f32.mxu0 %v512_v57  ;;  %v714_v22 = vld [vmem:[#allocation8 + $0x638] sm:$0xff]  ;;  %v2085_v24 = vpack.c.bf16 %v705_v18, %v701_v17  ;;  %v725_v57 = vld [vmem:[#allocation8 + $0x690] sm:$0xff]  ;;  %v1911_v18 = vpack.c.bf16 %v744_v9, %v740_v7 }
 0x198   :  { %v2087_v28 = vpack.c.bf16 %v714_v22, %v710_v21  ;;  %v2097_v0 = vpack.c.bf16 %v729_v58, %v725_v57  ;;  %v745_v21 = vld [vmem:[#allocation8 + $0x730] sm:$0xff]  ;;  %v748_v22 = vld [vmem:[#allocation8 + $0x748] sm:$0xff] }
 0x199   :  { %1878 = vmatpush1.bf16.msra.mxu1 %v1877_v30  ;;  %2070 = vmatpush1.bf16.msra.mxu0 %v2069_v31  ;;  %v713_v30 = vld [vmem:[#allocation8 + $0x630] sm:$0xff]  ;;  %v716_v31 = vld [vmem:[#allocation8 + $0x648] sm:$0xff] }
 0x19a   :  { %1880 = vmatprep.subr.bf16.mxu1 %v1879_v34  ;;  %2072 = vmatprep.subr.bf16.mxu0 %v2071_v35  ;;  %v722_v34 = vld [vmem:[#allocation8 + $0x678] sm:$0xff]  ;;  %v1897_v35 = vpack.c.bf16 %v711_v26, %v707_v25  ;;  %v2089_v40 = vpack.c.bf16 %v713_v30, %v709_v29  ;;  %v1899_v44 = vpack.c.bf16 %v720_v32, %v716_v31  ;;  %v747_v29 = vld [vmem:[#allocation8 + $0x740] sm:$0xff] }
 0x19b   :  { %v2091_v45 = vpack.c.bf16 %v722_v34, %v718_v33  ;;  %v750_v25 = vld [vmem:[#allocation8 + $0x758] sm:$0xff]  ;;  %v751_v30 = vld [vmem:[#allocation8 + $0x760] sm:$0xff]  ;;  %v749_v33 = vld [vmem:[#allocation8 + $0x750] sm:$0xff] }
 0x19c   :  { %v754_v26 = vld [vmem:[#allocation8 + $0x778] sm:$0xff]  ;;  %v753_v34 = vld [vmem:[#allocation8 + $0x770] sm:$0xff] }
 0x19d   :  { %1882 = vmatpush1.bf16.msra.mxu1 %v1881_v49  ;;  %2074 = vmatpush1.bf16.msra.mxu0 %v2073_v50  ;;  %v728_v49 = vld [vmem:[#allocation8 + $0x6a8] sm:$0xff]  ;;  %v726_v50 = vld [vmem:[#allocation8 + $0x698] sm:$0xff]  ;;  %v2107_v32 = vpack.c.bf16 %v754_v26, %v750_v25  ;;  %v779_v26 = vld [vmem:[#allocation8 + $0x840] sm:$0xff] }
 0x19e   :  { %1884 = vmatprep.subr.bf16.mxu1 %v1883_v52  ;;  %2076 = vmatprep.subr.bf16.mxu0 %v2075_v53  ;;  %v2093_v52 = vpack.c.bf16 %v721_v47, %v717_v46  ;;  %v723_v53 = vld [vmem:[#allocation8 + $0x680] sm:$0xff]  ;;  %v1903_v55 = vpack.c.bf16 %v728_v49, %v724_v48  ;;  %v2095_v56 = vpack.c.bf16 %v730_v8, %v726_v50  ;;  %v757_v8 = vld [vmem:[#allocation8 + $0x790] sm:$0xff] }
 0x19f   :  { %v1905_v63 = vpack.c.bf16 %v727_v54, %v723_v53  ;;  %v2109_v46 = vpack.c.bf16 %v753_v34, %v749_v33  ;;  %v755_v47 = vld [vmem:[#allocation8 + $0x780] sm:$0xff]  ;;  %v2111_v50 = vpack.c.bf16 %v762_v42, %v758_v41  ;;  %v768_v53 = vld [vmem:[#allocation8 + $0x7e8] sm:$0xff]  ;;  %v766_v54 = vld [vmem:[#allocation8 + $0x7d8] sm:$0xff] }
 0x1a0   :  { %v759_v48 = vld [vmem:[#allocation8 + $0x7a0] sm:$0xff]  ;;  %v792_v33 = vld [vmem:[#allocation8 + $0x8a8] sm:$0xff]  ;;  %v790_v34 = vld [vmem:[#allocation8 + $0x898] sm:$0xff] }
 0x1a1   :  { %1886 = vmatpush1.bf16.msra.mxu1 %v1885_v61  ;;  %2078 = vmatpush1.bf16.msra.mxu0 %v2077_v62  ;;  %v734_v61 = vld [vmem:[#allocation8 + $0x6d8] sm:$0xff]  ;;  %v1921_v58 = vpack.c.bf16 %v759_v48, %v755_v47  ;;  %v787_v42 = vld [vmem:[#allocation8 + $0x880] sm:$0xff]  ;;  %v789_v48 = vld [vmem:[#allocation8 + $0x890] sm:$0xff] }
 0x1a2   :  { %1888 = vmatprep.subr.bf16.mxu1 %v1887_v1  ;;  %2080 = vmatprep.subr.bf16.mxu0 %v2079_v2  ;;  %v738_v62 = vld [vmem:[#allocation8 + $0x6f8] sm:$0xff]  ;;  %v731_v1 = vld [vmem:[#allocation8 + $0x6c0] sm:$0xff] }
 0x1a3   :  { %v735_v2 = vld [vmem:[#allocation8 + $0x6e0] sm:$0xff]  ;;  %v2099_v4 = vpack.c.bf16 %v738_v62, %v734_v61 }
 0x1a4   :  { %v1909_v12 = vpack.c.bf16 %v735_v2, %v731_v1  ;;  %v767_v61 = vld [vmem:[#allocation8 + $0x7e0] sm:$0xff]  ;;  %v769_v1 = vld [vmem:[#allocation8 + $0x7f0] sm:$0xff]  ;;  %v772_v2 = vld [vmem:[#allocation8 + $0x808] sm:$0xff] }
 0x1a5   :  { %1890 = vmatpush1.bf16.msra.mxu1 %v1889_v10  ;;  %2082 = vmatpush1.bf16.msra.mxu0 %v2081_v11  ;;  %v742_v10 = vld [vmem:[#allocation8 + $0x718] sm:$0xff]  ;;  %v1925_v9 = vpack.c.bf16 %v767_v61, %v763_v60  ;;  %v801_v60 = vld [vmem:[#allocation8 + $0x8f0] sm:$0xff]  ;;  %v804_v61 = vld [vmem:[#allocation8 + $0x908] sm:$0xff] }
 0x1a6   :  { %1892 = vmatprep.subr.bf16.mxu1 %v1891_v14  ;;  %2084 = vmatprep.subr.bf16.mxu0 %v2083_v15  ;;  %v746_v11 = vld [vmem:[#allocation8 + $0x738] sm:$0xff]  ;;  %v739_v14 = vld [vmem:[#allocation8 + $0x700] sm:$0xff] }
 0x1a7   :  { %v743_v15 = vld [vmem:[#allocation8 + $0x720] sm:$0xff]  ;;  %v2103_v19 = vpack.c.bf16 %v746_v11, %v742_v10 }
 0x1a8   :  { %v771_v11 = vld [vmem:[#allocation8 + $0x800] sm:$0xff] }
 0x1a9   :  { %1894 = vmatpush1.bf16.msra.mxu1 %v1893_v23  ;;  %2086 = vmatpush1.bf16.msra.mxu0 %v2085_v24  ;;  %v752_v24 = vld [vmem:[#allocation8 + $0x768] sm:$0xff] }
 0x1aa   :  { %1896 = vmatprep.subr.bf16.mxu1 %v1895_v27  ;;  %2088 = vmatprep.subr.bf16.mxu0 %v2087_v28  ;;  %v1913_v27 = vpack.c.bf16 %v743_v15, %v739_v14  ;;  %v2105_v28 = vpack.c.bf16 %v745_v21, %v741_v20  ;;  %v1915_v31 = vpack.c.bf16 %v752_v24, %v748_v22  ;;  %v773_v15 = vld [vmem:[#allocation8 + $0x810] sm:$0xff]  ;;  %v784_v20 = vld [vmem:[#allocation8 + $0x868] sm:$0xff]  ;;  %v782_v21 = vld [vmem:[#allocation8 + $0x858] sm:$0xff] }
 0x1ab   :  { %v786_v22 = vld [vmem:[#allocation8 + $0x878] sm:$0xff] }
 0x1ad   :  { %1898 = vmatpush1.bf16.msra.mxu1 %v1897_v35  ;;  %2090 = vmatpush1.bf16.msra.mxu0 %v2089_v40  ;;  %v756_v35 = vld [vmem:[#allocation8 + $0x788] sm:$0xff] }
 0x1ae   :  { %1900 = vmatprep.subr.bf16.mxu1 %v1899_v44  ;;  %2092 = vmatprep.subr.bf16.mxu0 %v2091_v45  ;;  %v760_v40 = vld [vmem:[#allocation8 + $0x7a8] sm:$0xff]  ;;  %v272_v44 = vsub.s32 2, %v2611_v36  ;;  %v1917_v45 = vpack.c.bf16 %v751_v30, %v747_v29  ;;  %v2123_v29 = vpack.c.bf16 %v786_v22, %v782_v21  ;;  %v781_v30 = vld [vmem:[#allocation8 + $0x850] sm:$0xff] }
 0x1af   :  { %v1919_v49 = vpack.c.bf16 %v760_v40, %v756_v35  ;;  %v794_v35 = vld [vmem:[#allocation8 + $0x8b8] sm:$0xff]  ;;  %v813_v22 = vld [vmem:[#allocation8 + $0x950] sm:$0xff] }
 0x1b0   :  { %v273_v57 = vrot.slane %v2614_v38, %v272_v44  ;;  %v2127_v47 = vpack.c.bf16 %v794_v35, %v790_v34  ;;  %v825_v34 = vld [vmem:[#allocation8 + $0x9b0] sm:$0xff]  ;;  %v828_v35 = vld [vmem:[#allocation8 + $0x9c8] sm:$0xff] }
 0x1b1   :  { %1902 = vmatpush1.bf16.msra.mxu1 %v1901_v51  ;;  %2094 = vmatpush1.bf16.msra.mxu0 %v2093_v52  ;;  %v761_v51 = vld [vmem:[#allocation8 + $0x7b0] sm:$0xff]  ;;  %v764_v52 = vld [vmem:[#allocation8 + $0x7c8] sm:$0xff] }
 0x1b2   :  { %1904 = vmatprep.subr.bf16.mxu1 %v1903_v55  ;;  %2096 = vmatprep.subr.bf16.mxu0 %v2095_v56  ;;  %v770_v55 = vld [vmem:[#allocation8 + $0x7f8] sm:$0xff]  ;;  %v284_v56 = vsub.s32 5, %v2611_v36  ;;  %v2113_v59 = vpack.c.bf16 %v761_v51, %v757_v8  ;;  %v1923_v62 = vpack.c.bf16 %v768_v53, %v764_v52  ;;  %v434_v7 = vadd.f32 %v2627_v43, %v273_v57  ;;  %v800_v8 = vld [vmem:[#allocation8 + $0x8e8] sm:$0xff] }
 0x1b3   :  { %v798_v51 = vld [vmem:[#allocation8 + $0x8d8] sm:$0xff] }
 0x1b4   :  { %v285_v6 = vrot.slane %v2614_v38, %v284_v56  ;;  %v511_v24 = vmax.f32 %v434_v7, 0.0  ;;  %v802_v52 = vld [vmem:[#allocation8 + $0x8f8] sm:$0xff]  ;;  %v799_v56 = vld [vmem:[#allocation8 + $0x8e0] sm:$0xff]  ;;  %v805_v7 = vld [vmem:[#allocation8 + $0x910] sm:$0xff] }
 0x1b5   :  { %1906 = vmatpush1.bf16.msra.mxu1 %v1905_v63  ;;  %2098 = vmatpush1.bf16.msra.mxu0 %v2097_v0  ;;  %v2629_v17 = vpop.f32.mrb[2].mxu0  ;;  %v2115_v63 = vpack.c.bf16 %v770_v55, %v766_v54  ;;  %v765_v0 = vld [vmem:[#allocation8 + $0x7d0] sm:$0xff]  ;;  %v795_v55 = vld [vmem:[#allocation8 + $0x8c0] sm:$0xff] }
 0x1b6   :  { %1908 = vmatprep.subr.bf16.mxu1 %v1907_v3  ;;  %2100 = vmatprep.subr.bf16.mxu0 %v2099_v4  ;;  %v2631_v23 = vpop.f32.mrb[3].mxu0  ;;  %v776_v3 = vld [vmem:[#allocation8 + $0x828] sm:$0xff]  ;;  %v774_v4 = vld [vmem:[#allocation8 + $0x818] sm:$0xff]  ;;  %v2117_v10 = vpack.c.bf16 %v769_v1, %v765_v0  ;;  %v1941_v1 = vpack.c.bf16 %v799_v56, %v795_v55 }
 0x1b7   :  { %v2119_v14 = vpack.c.bf16 %v778_v5, %v774_v4  ;;  %v507_v38 = vadd.f32 %v2631_v23, %v285_v6  ;;  %v810_v0 = vld [vmem:[#allocation8 + $0x938] sm:$0xff]  ;;  %v807_v4 = vld [vmem:[#allocation8 + $0x920] sm:$0xff] }
 0x1b9   :  { %1910 = vmatpush1.bf16.msra.mxu1 %v1909_v12  ;;  %2102 = vmatpush1.bf16.msra.mxu0 %v2101_v13  ;;  %v775_v12 = vld [vmem:[#allocation8 + $0x820] sm:$0xff]  ;;  %v1927_v13 = vpack.c.bf16 %v776_v3, %v772_v2  ;;  %v514_v40 = vmax.f32 %v507_v38, 0.0  ;;  %v817_v38 = vld [vmem:[#allocation8 + $0x970] sm:$0xff] }
 0x1ba   :  { %1912 = vmatprep.subr.bf16.mxu1 %v1911_v18  ;;  %2104 = vmatprep.subr.bf16.mxu0 %v2103_v19  ;;  %v777_v18 = vld [vmem:[#allocation8 + $0x830] sm:$0xff]  ;;  %v780_v19 = vld [vmem:[#allocation8 + $0x848] sm:$0xff]  ;;  %v1929_v43 = vpack.c.bf16 %v775_v12, %v771_v11  ;;  %v803_v3 = vld [vmem:[#allocation8 + $0x900] sm:$0xff] }
 0x1bb   :  { %v2121_v25 = vpack.c.bf16 %v777_v18, %v773_v15  ;;  %v816_v11 = vld [vmem:[#allocation8 + $0x968] sm:$0xff]  ;;  %v814_v12 = vld [vmem:[#allocation8 + $0x958] sm:$0xff]  ;;  %v811_v18 = vld [vmem:[#allocation8 + $0x940] sm:$0xff] }
 0x1bd   :  { %1914 = vmatpush1.bf16.msra.mxu1 %v1913_v27  ;;  %2106 = vmatpush1.bf16.msra.mxu0 %v2105_v28  ;;  %v783_v27 = vld [vmem:[#allocation8 + $0x860] sm:$0xff]  ;;  %v1931_v28 = vpack.c.bf16 %v784_v20, %v780_v19 }
 0x1be   :  { %1916 = vmatprep.subr.bf16.mxu1 %v1915_v31  ;;  %2108 = vmatprep.subr.bf16.mxu0 %v2107_v32  ;;  %v785_v31 = vld [vmem:[#allocation8 + $0x870] sm:$0xff]  ;;  %v788_v32 = vld [vmem:[#allocation8 + $0x888] sm:$0xff]  ;;  %v1933_v23 = vpack.c.bf16 %v783_v27, %v779_v26  ;;  %v815_v19 = vld [vmem:[#allocation8 + $0x960] sm:$0xff] }
 0x1bf   :  { %v2125_v41 = vpack.c.bf16 %v785_v31, %v781_v30  ;;  %v826_v26 = vld [vmem:[#allocation8 + $0x9b8] sm:$0xff]  ;;  %v1949_v27 = vpack.c.bf16 %v815_v19, %v811_v18  ;;  %v823_v30 = vld [vmem:[#allocation8 + $0x9a0] sm:$0xff] }
 0x1c1   :  { %1918 = vmatpush1.bf16.msra.mxu1 %v1917_v45  ;;  %2110 = vmatpush1.bf16.msra.mxu0 %v2109_v46  ;;  %v791_v45 = vld [vmem:[#allocation8 + $0x8a0] sm:$0xff]  ;;  %v1935_v46 = vpack.c.bf16 %v792_v33, %v788_v32  ;;  %v821_v33 = vld [vmem:[#allocation8 + $0x990] sm:$0xff] }
 0x1c2   :  { %1920 = vmatprep.subr.bf16.mxu1 %v1919_v49  ;;  %2112 = vmatprep.subr.bf16.mxu0 %v2111_v50  ;;  %v793_v49 = vld [vmem:[#allocation8 + $0x8b0] sm:$0xff]  ;;  %v796_v50 = vld [vmem:[#allocation8 + $0x8c8] sm:$0xff]  ;;  %v1937_v53 = vpack.c.bf16 %v791_v45, %v787_v42  ;;  %v2145_v45 = vpack.c.bf16 %v825_v34, %v821_v33 }
 0x1c3   :  { %v2129_v54 = vpack.c.bf16 %v793_v49, %v789_v48  ;;  %v1939_v57 = vpack.c.bf16 %v800_v8, %v796_v50  ;;  %v829_v50 = vld [vmem:[#allocation8 + $0x9d0] sm:$0xff] }
 0x1c4   :  { %v833_v8 = vld [vmem:[#allocation8 + $0x9f0] sm:$0xff] }
 0x1c5   :  { %1922 = vmatpush1.bf16.msra.mxu1 %v1921_v58  ;;  %2114 = vmatpush1.bf16.msra.mxu0 %v2113_v59  ;;  %v2131_v58 = vpack.c.bf16 %v802_v52, %v798_v51  ;;  %v797_v59 = vld [vmem:[#allocation8 + $0x8d0] sm:$0xff]  ;;  %v836_v51 = vld [vmem:[#allocation8 + $0xa08] sm:$0xff]  ;;  %v2149_v56 = vpack.c.bf16 %v833_v8, %v829_v50 }
 0x1c6   :  { %1924 = vmatprep.subr.bf16.mxu1 %v1923_v62  ;;  %2116 = vmatprep.subr.bf16.mxu0 %v2115_v63  ;;  %v808_v62 = vld [vmem:[#allocation8 + $0x928] sm:$0xff]  ;;  %v806_v63 = vld [vmem:[#allocation8 + $0x918] sm:$0xff]  ;;  %v2133_v2 = vpack.c.bf16 %v801_v60, %v797_v59 }
 0x1c7   :  { %v1943_v5 = vpack.c.bf16 %v808_v62, %v804_v61  ;;  %v2135_v6 = vpack.c.bf16 %v810_v0, %v806_v63  ;;  %v840_v52 = vld [vmem:[#allocation8 + $0xa28] sm:$0xff]  ;;  %v837_v61 = vld [vmem:[#allocation8 + $0xa10] sm:$0xff] }
 0x1c8   :  { %v1959_v59 = vpack.c.bf16 %v840_v52, %v836_v51  ;;  %v841_v62 = vld [vmem:[#allocation8 + $0xa30] sm:$0xff]  ;;  %v844_v63 = vld [vmem:[#allocation8 + $0xa48] sm:$0xff] }
 0x1c9   :  { %1926 = vmatpush1.bf16.msra.mxu1 %v1925_v9  ;;  %2118 = vmatpush1.bf16.msra.mxu0 %v2117_v10  ;;  %v809_v9 = vld [vmem:[#allocation8 + $0x930] sm:$0xff]  ;;  %v812_v10 = vld [vmem:[#allocation8 + $0x948] sm:$0xff] }
 0x1ca   :  { %1928 = vmatprep.subr.bf16.mxu1 %v1927_v13  ;;  %2120 = vmatprep.subr.bf16.mxu0 %v2119_v14  ;;  %v818_v13 = vld [vmem:[#allocation8 + $0x978] sm:$0xff]  ;;  %v1945_v14 = vpack.c.bf16 %v807_v4, %v803_v3  ;;  %v2137_v15 = vpack.c.bf16 %v809_v9, %v805_v7  ;;  %v1947_v20 = vpack.c.bf16 %v816_v11, %v812_v10  ;;  %v848_v0 = vld [vmem:[#allocation8 + $0xa68] sm:$0xff]  ;;  %v845_v10 = vld [vmem:[#allocation8 + $0xa50] sm:$0xff] }
 0x1cb   :  { %v2139_v21 = vpack.c.bf16 %v818_v13, %v814_v12  ;;  %v2153_v4 = vpack.c.bf16 %v841_v62, %v837_v61  ;;  %v1963_v7 = vpack.c.bf16 %v848_v0, %v844_v63  ;;  %v849_v11 = vld [vmem:[#allocation8 + $0xa70] sm:$0xff]  ;;  %v852_v12 = vld [vmem:[#allocation8 + $0xa88] sm:$0xff] }
 0x1cc   :  { %1057 = vmatmul.mubr.f32.vlgmr.msra.gmra.mrb[2].mxu1 %v511_v24  ;;  %1270 = vmatmul.mubr.f32.vlgmr.msra.gmra.mrb[4].mxu0 %v511_v24  ;;  %v820_v24 = vld [vmem:[#allocation8 + $0x988] sm:$0xff]  ;;  %v2157_v19 = vpack.c.bf16 %v849_v11, %v845_v10  ;;  %v869_v51 = vld [vmem:[#allocation8 + $0xb10] sm:$0xff]  ;;  %v280_v10 = vsub.s32 4, %v2611_v36 }
 0x1cd   :  { %1930 = vmatpush1.bf16.msra.mxu1 %v1929_v43  ;;  %2122 = vmatpush1.bf16.msra.mxu0 %v2121_v25  ;;  %v824_v43 = vld [vmem:[#allocation8 + $0x9a8] sm:$0xff]  ;;  %v822_v25 = vld [vmem:[#allocation8 + $0x998] sm:$0xff]  ;;  %v873_v52 = vld [vmem:[#allocation8 + $0xb30] sm:$0xff] }
 0x1ce   :  { %1932 = vmatprep.subr.bf16.mxu1 %v1931_v28  ;;  %2124 = vmatprep.subr.bf16.mxu0 %v2123_v29  ;;  %v2141_v28 = vpack.c.bf16 %v817_v38, %v813_v22  ;;  %v819_v29 = vld [vmem:[#allocation8 + $0x980] sm:$0xff]  ;;  %v1951_v31 = vpack.c.bf16 %v824_v43, %v820_v24  ;;  %v2143_v32 = vpack.c.bf16 %v826_v26, %v822_v25  ;;  %v856_v13 = vld [vmem:[#allocation8 + $0xaa8] sm:$0xff]  ;;  %v853_v24 = vld [vmem:[#allocation8 + $0xa90] sm:$0xff] }
 0x1cf   :  { %1127 = vmatprep.mubr.f32.mxu1 %v514_v40  ;;  %1340 = vmatprep.mubr.f32.mxu0 %v514_v40  ;;  %v832_v40 = vld [vmem:[#allocation8 + $0x9e8] sm:$0xff]  ;;  %v1953_v42 = vpack.c.bf16 %v823_v30, %v819_v29  ;;  %v1967_v22 = vpack.c.bf16 %v856_v13, %v852_v12  ;;  %v857_v43 = vld [vmem:[#allocation8 + $0xab0] sm:$0xff] }
 0x1d0   :  { %v1955_v48 = vpack.c.bf16 %v832_v40, %v828_v35  ;;  %v860_v25 = vld [vmem:[#allocation8 + $0xac8] sm:$0xff]  ;;  %v2161_v30 = vpack.c.bf16 %v857_v43, %v853_v24  ;;  %v861_v35 = vld [vmem:[#allocation8 + $0xad0] sm:$0xff]  ;;  %v2273_v24 = vld [vmem:[#allocation7] sm:$0x3f] }
 0x1d1   :  { %1934 = vmatpush1.bf16.msra.mxu1 %v1933_v23  ;;  %2126 = vmatpush1.bf16.msra.mxu0 %v2125_v41  ;;  %v830_v23 = vld [vmem:[#allocation8 + $0x9d8] sm:$0xff]  ;;  %v864_v26 = vld [vmem:[#allocation8 + $0xae8] sm:$0xff]  ;;  %v865_v40 = vld [vmem:[#allocation8 + $0xaf0] sm:$0xff]  ;;  %v281_v43 = vrot.slane %v2273_v24, %v280_v10 }
 0x1d2   :  { %1936 = vmatprep.subr.bf16.mxu1 %v1935_v46  ;;  %2128 = vmatprep.subr.bf16.mxu0 %v2127_v47  ;;  %v834_v41 = vld [vmem:[#allocation8 + $0x9f8] sm:$0xff]  ;;  %v827_v46 = vld [vmem:[#allocation8 + $0x9c0] sm:$0xff]  ;;  %v1971_v33 = vpack.c.bf16 %v864_v26, %v860_v25  ;;  %v877_v63 = vld [vmem:[#allocation8 + $0xb50] sm:$0xff] }
 0x1d3   :  { %v831_v47 = vld [vmem:[#allocation8 + $0x9e0] sm:$0xff]  ;;  %v2147_v49 = vpack.c.bf16 %v834_v41, %v830_v23  ;;  %v868_v23 = vld [vmem:[#allocation8 + $0xb08] sm:$0xff]  ;;  %v881_v0 = vld [vmem:[#allocation8 + $0xb70] sm:$0xff] }
 0x1d4   :  { %v1957_v55 = vpack.c.bf16 %v831_v47, %v827_v46  ;;  %v872_v41 = vld [vmem:[#allocation8 + $0xb28] sm:$0xff]  ;;  %v2165_v47 = vpack.c.bf16 %v865_v40, %v861_v35  ;;  %v885_v13 = vld [vmem:[#allocation8 + $0xb90] sm:$0xff] }
 0x1d5   :  { %1938 = vmatpush1.bf16.msra.mxu1 %v1937_v53  ;;  %2130 = vmatpush1.bf16.msra.mxu0 %v2129_v54  ;;  %v838_v53 = vld [vmem:[#allocation8 + $0xa18] sm:$0xff]  ;;  %v1975_v50 = vpack.c.bf16 %v872_v41, %v868_v23  ;;  %v1351_v40 = vld [vmem:[#allocation11] sm:$0xff]  ;;  %v1352_v23 = vld [vmem:[#allocation11 + $0x8] sm:$0xff] }
 0x1d6   :  { %1940 = vmatprep.subr.bf16.mxu1 %v1939_v57  ;;  %2132 = vmatprep.subr.bf16.mxu0 %v2131_v58  ;;  %v842_v54 = vld [vmem:[#allocation8 + $0xa38] sm:$0xff]  ;;  %v835_v57 = vld [vmem:[#allocation8 + $0xa00] sm:$0xff]  ;;  %v1380_v10 = vld [vmem:[#allocation11 + $0xe8] sm:$0xff] }
 0x1d7   :  { %v839_v58 = vld [vmem:[#allocation8 + $0xa20] sm:$0xff]  ;;  %v2151_v60 = vpack.c.bf16 %v842_v54, %v838_v53  ;;  %v876_v53 = vld [vmem:[#allocation8 + $0xb48] sm:$0xff]  ;;  %v1369_v41 = vld [vmem:[#allocation11 + $0x90] sm:$0xff] }
 0x1d8   :  { %v1961_v3 = vpack.c.bf16 %v839_v58, %v835_v57  ;;  %v880_v54 = vld [vmem:[#allocation8 + $0xb68] sm:$0xff]  ;;  %v2169_v58 = vpack.c.bf16 %v873_v52, %v869_v51 }
 0x1d9   :  { %1942 = vmatpush1.bf16.msra.mxu1 %v1941_v1  ;;  %2134 = vmatpush1.bf16.msra.mxu0 %v2133_v2  ;;  %v846_v1 = vld [vmem:[#allocation8 + $0xa58] sm:$0xff]  ;;  %v1979_v61 = vpack.c.bf16 %v880_v54, %v876_v53  ;;  %v1355_v52 = vld [vmem:[#allocation11 + $0x20] sm:$0xff]  ;;  %v1356_v53 = vld [vmem:[#allocation11 + $0x28] sm:$0xff] }
 0x1da   :  { %1944 = vmatprep.subr.bf16.mxu1 %v1943_v5  ;;  %2136 = vmatprep.subr.bf16.mxu0 %v2135_v6  ;;  %v850_v2 = vld [vmem:[#allocation8 + $0xa78] sm:$0xff]  ;;  %v843_v5 = vld [vmem:[#allocation8 + $0xa40] sm:$0xff] }
 0x1db   :  { %v847_v6 = vld [vmem:[#allocation8 + $0xa60] sm:$0xff]  ;;  %v2155_v9 = vpack.c.bf16 %v850_v2, %v846_v1  ;;  %v884_v1 = vld [vmem:[#allocation8 + $0xb88] sm:$0xff]  ;;  %v1373_v54 = vld [vmem:[#allocation11 + $0xb0] sm:$0xff] }
 0x1dc   :  { %v1965_v18 = vpack.c.bf16 %v847_v6, %v843_v5  ;;  %v888_v2 = vld [vmem:[#allocation8 + $0xba8] sm:$0xff]  ;;  %v2173_v6 = vpack.c.bf16 %v881_v0, %v877_v63 }
 0x1dd   :  { %1946 = vmatpush1.bf16.msra.mxu1 %v1945_v14  ;;  %2138 = vmatpush1.bf16.msra.mxu0 %v2137_v15  ;;  %v854_v14 = vld [vmem:[#allocation8 + $0xa98] sm:$0xff]  ;;  %v1983_v11 = vpack.c.bf16 %v888_v2, %v884_v1  ;;  %v1359_v0 = vld [vmem:[#allocation11 + $0x40] sm:$0xff]  ;;  %v1360_v1 = vld [vmem:[#allocation11 + $0x48] sm:$0xff] }
 0x1de   :  { %1948 = vmatprep.subr.bf16.mxu1 %v1947_v20  ;;  %2140 = vmatprep.subr.bf16.mxu0 %v2139_v21  ;;  %v858_v15 = vld [vmem:[#allocation8 + $0xab8] sm:$0xff]  ;;  %v851_v20 = vld [vmem:[#allocation8 + $0xa80] sm:$0xff] }
 0x1df   :  { %v855_v21 = vld [vmem:[#allocation8 + $0xaa0] sm:$0xff]  ;;  %v2159_v38 = vpack.c.bf16 %v858_v15, %v854_v14  ;;  %v889_v14 = vld [vmem:[#allocation8 + $0xbb0] sm:$0xff]  ;;  %v892_v15 = vld [vmem:[#allocation8 + $0xbc8] sm:$0xff] }
 0x1e0   :  { %v1969_v29 = vpack.c.bf16 %v855_v21, %v851_v20  ;;  %v898_v20 = vld [vmem:[#allocation8 + $0xbf8] sm:$0xff]  ;;  %v1399_v24 = vld [vmem:[#allocation11 + $0x180] sm:$0xff] }
 0x1e1   :  { %1950 = vmatpush1.bf16.msra.mxu1 %v1949_v27  ;;  %2142 = vmatpush1.bf16.msra.mxu0 %v2141_v28  ;;  %v862_v27 = vld [vmem:[#allocation8 + $0xad8] sm:$0xff] }
 0x1e2   :  { %1952 = vmatprep.subr.bf16.mxu1 %v1951_v31  ;;  %2144 = vmatprep.subr.bf16.mxu0 %v2143_v32  ;;  %v866_v28 = vld [vmem:[#allocation8 + $0xaf8] sm:$0xff]  ;;  %v859_v31 = vld [vmem:[#allocation8 + $0xac0] sm:$0xff] }
 0x1e3   :  { %v863_v32 = vld [vmem:[#allocation8 + $0xae0] sm:$0xff]  ;;  %v2163_v34 = vpack.c.bf16 %v866_v28, %v862_v27  ;;  %v893_v28 = vld [vmem:[#allocation8 + $0xbd0] sm:$0xff] }
 0x1e4   :  { %v1973_v46 = vpack.c.bf16 %v863_v32, %v859_v31  ;;  %v895_v27 = vld [vmem:[#allocation8 + $0xbe0] sm:$0xff]  ;;  %v1368_v31 = vld [vmem:[#allocation11 + $0x88] sm:$0xff]  ;;  %v1377_v2 = vld [vmem:[#allocation11 + $0xd0] sm:$0xff] }
 0x1e5   :  { %1954 = vmatpush1.bf16.msra.mxu1 %v1953_v42  ;;  %2146 = vmatpush1.bf16.msra.mxu0 %v2145_v45  ;;  %v870_v42 = vld [vmem:[#allocation8 + $0xb18] sm:$0xff] }
 0x1e6   :  { %1956 = vmatprep.subr.bf16.mxu1 %v1955_v48  ;;  %2148 = vmatprep.subr.bf16.mxu0 %v2147_v49  ;;  %v874_v45 = vld [vmem:[#allocation8 + $0xb38] sm:$0xff]  ;;  %v867_v48 = vld [vmem:[#allocation8 + $0xb00] sm:$0xff] }
 0x1e7   :  { %v871_v49 = vld [vmem:[#allocation8 + $0xb20] sm:$0xff]  ;;  %v2167_v8 = vpack.c.bf16 %v874_v45, %v870_v42  ;;  %v2185_v45 = vpack.c.bf16 %v1352_v23, %v1351_v40  ;;  %v1384_v40 = vld [vmem:[#allocation11 + $0x108] sm:$0xff] }
 0x1e8   :  { %v1977_v57 = vpack.c.bf16 %v871_v49, %v867_v48  ;;  %v1370_v42 = vld [vmem:[#allocation11 + $0x98] sm:$0xff]  ;;  %v1353_v48 = vld [vmem:[#allocation11 + $0x10] sm:$0xff] }
 0x1e9   :  { %1958 = vmatpush1.bf16.msra.mxu1 %v1957_v55  ;;  %2150 = vmatpush1.bf16.msra.mxu0 %v2149_v56  ;;  %v878_v55 = vld [vmem:[#allocation8 + $0xb58] sm:$0xff] }
 0x1ea   :  { %1960 = vmatprep.subr.bf16.mxu1 %v1959_v59  ;;  %2152 = vmatprep.subr.bf16.mxu0 %v2151_v60  ;;  %v882_v56 = vld [vmem:[#allocation8 + $0xb78] sm:$0xff]  ;;  %v875_v59 = vld [vmem:[#allocation8 + $0xb40] sm:$0xff] }
 0x1eb   :  { %v879_v60 = vld [vmem:[#allocation8 + $0xb60] sm:$0xff]  ;;  %v2171_v62 = vpack.c.bf16 %v882_v56, %v878_v55  ;;  %v2193_v56 = vpack.c.bf16 %v1356_v53, %v1355_v52  ;;  %v1388_v53 = vld [vmem:[#allocation11 + $0x128] sm:$0xff] }
 0x1ec   :  { %v1981_v5 = vpack.c.bf16 %v879_v60, %v875_v59  ;;  %v1354_v49 = vld [vmem:[#allocation11 + $0x18] sm:$0xff]  ;;  %v1375_v60 = vld [vmem:[#allocation11 + $0xc0] sm:$0xff] }
 0x1ed   :  { %1962 = vmatpush1.bf16.msra.mxu1 %v1961_v3  ;;  %2154 = vmatpush1.bf16.msra.mxu0 %v2153_v4  ;;  %v886_v3 = vld [vmem:[#allocation8 + $0xb98] sm:$0xff]  ;;  %v1387_v52 = vld [vmem:[#allocation11 + $0x120] sm:$0xff] }
 0x1ee   :  { %1964 = vmatprep.subr.bf16.mxu1 %v1963_v7  ;;  %2156 = vmatprep.subr.bf16.mxu0 %v2155_v9  ;;  %v890_v4 = vld [vmem:[#allocation8 + $0xbb8] sm:$0xff]  ;;  %v883_v7 = vld [vmem:[#allocation8 + $0xb80] sm:$0xff] }
 0x1ef   :  { %v887_v9 = vld [vmem:[#allocation8 + $0xba0] sm:$0xff]  ;;  %v2175_v12 = vpack.c.bf16 %v890_v4, %v886_v3  ;;  %v2201_v4 = vpack.c.bf16 %v1360_v1, %v1359_v0  ;;  %v1392_v1 = vld [vmem:[#allocation11 + $0x148] sm:$0xff] }
 0x1f0   :  { %v1985_v21 = vpack.c.bf16 %v887_v9, %v883_v7  ;;  %v1374_v55 = vld [vmem:[#allocation11 + $0xb8] sm:$0xff]  ;;  %v1379_v9 = vld [vmem:[#allocation11 + $0xe0] sm:$0xff] }
 0x1f1   :  { %1966 = vmatpush1.bf16.msra.mxu1 %v1965_v18  ;;  %2158 = vmatpush1.bf16.msra.mxu0 %v2157_v19  ;;  %v896_v18 = vld [vmem:[#allocation8 + $0xbe8] sm:$0xff]  ;;  %v894_v19 = vld [vmem:[#allocation8 + $0xbd8] sm:$0xff] }
 0x1f2   :  { %1968 = vmatprep.subr.bf16.mxu1 %v1967_v22  ;;  %2160 = vmatprep.subr.bf16.mxu0 %v2159_v38  ;;  %v2177_v22 = vpack.c.bf16 %v889_v14, %v885_v13  ;;  %v891_v38 = vld [vmem:[#allocation8 + $0xbc0] sm:$0xff]  ;;  %v1987_v25 = vpack.c.bf16 %v896_v18, %v892_v15  ;;  %v2179_v26 = vpack.c.bf16 %v898_v20, %v894_v19  ;;  %v1364_v14 = vld [vmem:[#allocation11 + $0x68] sm:$0xff]  ;;  %v1381_v18 = vld [vmem:[#allocation11 + $0xf0] sm:$0xff] }
 0x1f3   :  { %v1989_v32 = vpack.c.bf16 %v895_v27, %v891_v38  ;;  %v1358_v59 = vld [vmem:[#allocation11 + $0x38] sm:$0xff]  ;;  %v1363_v13 = vld [vmem:[#allocation11 + $0x60] sm:$0xff] }
 0x1f4   :  { %v1378_v3 = vld [vmem:[#allocation11 + $0xd8] sm:$0xff]  ;;  %v2209_v15 = vpack.c.bf16 %v1364_v14, %v1363_v13  ;;  %v1391_v0 = vld [vmem:[#allocation11 + $0x140] sm:$0xff]  ;;  %v1396_v14 = vld [vmem:[#allocation11 + $0x168] sm:$0xff] }
 0x1f5   :  { %1970 = vmatpush1.bf16.msra.mxu1 %v1969_v29  ;;  %2162 = vmatpush1.bf16.msra.mxu0 %v2161_v30  ;;  %v897_v29 = vld [vmem:[#allocation8 + $0xbf0] sm:$0xff]  ;;  %v1367_v30 = vld [vmem:[#allocation11 + $0x80] sm:$0xff]  ;;  %v1362_v7 = vld [vmem:[#allocation11 + $0x58] sm:$0xff] }
 0x1f6   :  { %1972 = vmatprep.subr.bf16.mxu1 %v1971_v33  ;;  %2164 = vmatprep.subr.bf16.mxu0 %v2163_v34  ;;  %v2181_v33 = vpack.c.bf16 %v897_v29, %v893_v28  ;;  %v505_v34 = vadd.f32 %v2629_v17, %v281_v43  ;;  %v2183_v35 = vpack.c.bf16 %v1368_v31, %v1367_v30  ;;  %v1382_v19 = vld [vmem:[#allocation11 + $0xf8] sm:$0xff]  ;;  %v1400_v43 = vld [vmem:[#allocation11 + $0x188] sm:$0xff]  ;;  %v1395_v13 = vld [vmem:[#allocation11 + $0x160] sm:$0xff] }
 0x1f7   :  { %v2189_v17 = vpack.c.bf16 %v1354_v49, %v1353_v48  ;;  %v2211_v20 = vpack.c.bf16 %v1382_v19, %v1381_v18  ;;  %v1385_v48 = vld [vmem:[#allocation11 + $0x110] sm:$0xff]  ;;  %v1386_v49 = vld [vmem:[#allocation11 + $0x118] sm:$0xff]  ;;  %v2241_v19 = vpack.c.bf16 %v1396_v14, %v1395_v13 }
 0x1f8   :  { %v1414_v18 = vld [vmem:[#allocation11 + $0x1f8] sm:$0xff] }
 0x1f9   :  { %1974 = vmatpush1.bf16.msra.mxu1 %v1973_v46  ;;  %2166 = vmatpush1.bf16.msra.mxu0 %v2165_v47  ;;  %v513_v46 = vmax.f32 %v505_v34, 0.0  ;;  %v2187_v47 = vpack.c.bf16 %v1370_v42, %v1369_v41  ;;  %v1401_v42 = vld [vmem:[#allocation11 + $0x190] sm:$0xff] }
 0x1fa   :  { %1976 = vmatprep.subr.bf16.mxu1 %v1975_v50  ;;  %2168 = vmatprep.subr.bf16.mxu0 %v2167_v8  ;;  %v1371_v50 = vld [vmem:[#allocation11 + $0xa0] sm:$0xff]  ;;  %v1372_v8 = vld [vmem:[#allocation11 + $0xa8] sm:$0xff] }
 0x1fb   :  { %v2191_v51 = vpack.c.bf16 %v1372_v8, %v1371_v50  ;;  %v1404_v8 = vld [vmem:[#allocation11 + $0x1a8] sm:$0xff] }
 0x1fd   :  { %1978 = vmatpush1.bf16.msra.mxu1 %v1977_v57  ;;  %2170 = vmatpush1.bf16.msra.mxu0 %v2169_v58  ;;  %v2195_v57 = vpack.c.bf16 %v1374_v55, %v1373_v54  ;;  %v1357_v58 = vld [vmem:[#allocation11 + $0x30] sm:$0xff]  ;;  %v1406_v55 = vld [vmem:[#allocation11 + $0x1b8] sm:$0xff] }
 0x1fe   :  { %1980 = vmatprep.subr.bf16.mxu1 %v1979_v61  ;;  %2172 = vmatprep.subr.bf16.mxu0 %v2171_v62  ;;  %v1376_v61 = vld [vmem:[#allocation11 + $0xc8] sm:$0xff]  ;;  %v2197_v62 = vpack.c.bf16 %v1358_v59, %v1357_v58  ;;  %v1405_v54 = vld [vmem:[#allocation11 + $0x1b0] sm:$0xff]  ;;  %v1390_v59 = vld [vmem:[#allocation11 + $0x138] sm:$0xff] }
 0x1ff   :  { %v2199_v63 = vpack.c.bf16 %v1376_v61, %v1375_v60  ;;  %v1389_v58 = vld [vmem:[#allocation11 + $0x130] sm:$0xff]  ;;  %v1407_v60 = vld [vmem:[#allocation11 + $0x1c0] sm:$0xff]  ;;  %v1408_v61 = vld [vmem:[#allocation11 + $0x1c8] sm:$0xff] }
 0x201   :  { %1982 = vmatpush1.bf16.msra.mxu1 %v1981_v5  ;;  %2174 = vmatpush1.bf16.msra.mxu0 %v2173_v6  ;;  %v2203_v5 = vpack.c.bf16 %v1378_v3, %v1377_v2  ;;  %v1361_v6 = vld [vmem:[#allocation11 + $0x50] sm:$0xff]  ;;  %v1410_v3 = vld [vmem:[#allocation11 + $0x1d8] sm:$0xff] }
 0x202   :  { %1984 = vmatprep.subr.bf16.mxu1 %v1983_v11  ;;  %2176 = vmatprep.subr.bf16.mxu0 %v2175_v12  ;;  %v2205_v11 = vpack.c.bf16 %v1362_v7, %v1361_v6  ;;  %v2207_v12 = vpack.c.bf16 %v1380_v10, %v1379_v9  ;;  %v1409_v2 = vld [vmem:[#allocation11 + $0x1d0] sm:$0xff]  ;;  %v1394_v7 = vld [vmem:[#allocation11 + $0x158] sm:$0xff]  ;;  %v1411_v9 = vld [vmem:[#allocation11 + $0x1e0] sm:$0xff] }
 0x203   :  { %v1393_v6 = vld [vmem:[#allocation11 + $0x150] sm:$0xff]  ;;  %v1412_v10 = vld [vmem:[#allocation11 + $0x1e8] sm:$0xff] }
 0x205   :  { %1986 = vmatpush1.bf16.msra.mxu1 %v1985_v21  ;;  %2178 = vmatpush1.bf16.msra.mxu0 %v2177_v22  ;;  %v1365_v21 = vld [vmem:[#allocation11 + $0x70] sm:$0xff]  ;;  %v1366_v22 = vld [vmem:[#allocation11 + $0x78] sm:$0xff] }
 0x206   :  { %1988 = vmatprep.subr.bf16.mxu1 %v1987_v25  ;;  %2180 = vmatprep.subr.bf16.mxu0 %v2179_v26  ;;  %v2213_v38 = vpack.c.bf16 %v1366_v22, %v1365_v21  ;;  %v2215_v25 = vpack.c.bf16 %v1400_v43, %v1399_v24  ;;  %v2643_v26 = vld [vmem:[#allocation10] sm:$0xf]  ;;  %v1397_v22 = vld [vmem:[#allocation11 + $0x170] sm:$0xff] }
 0x207   :  { %v904_v27 = vrot.slane %v2643_v26, %v264_v37  ;;  %v908_v28 = vrot.slane %v2643_v26, %v268_v39  ;;  %v916_v29 = vrot.slane %v2643_v26, %v276_v16  ;;  %v1402_v37 = vld [vmem:[#allocation11 + $0x198] sm:$0xff]  ;;  %v1403_v16 = vld [vmem:[#allocation11 + $0x1a0] sm:$0xff] }
 0x208   :  { %v2219_v39 = vpack.c.bf16 %v1402_v37, %v1401_v42 }
 0x209   :  { %1990 = vmatpush1.bf16.msra.mxu1 %v1989_v32  ;;  %2182 = vmatpush1.bf16.msra.mxu0 %v2181_v33 }
 0x20a   :  { %2184 = vmatprep.subr.bf16.mxu1 %v2183_v35  ;;  %v1383_v35 = vld [vmem:[#allocation11 + $0x100] sm:$0xff] }
 0x20c   :  { %1128 = vmatmul.mubr.f32.vlgmr.msra.gmra.mrb[2].mxu1 %v513_v46  ;;  %1341 = vmatmul.mubr.f32.vlgmr.msra.gmra.mrb[4].mxu0 %v513_v46  ;;  %v2217_v46 = vpack.c.bf16 %v1384_v40, %v1383_v35 }
 0x20d   :  { %2186 = vmatpush3.bf16.msra.mxu1 %v2185_v45 }
 0x20e   :  { %2188 = vmatprep.subr.bf16.mxu1 %v2187_v47 }
 0x211   :  { %2190 = vmatpush3.bf16.msra.mxu1 %v2189_v17  ;;  %v2221_v17 = vpack.c.bf16 %v1386_v49, %v1385_v48 }
 0x212   :  { %2192 = vmatprep.subr.bf16.mxu1 %v2191_v51  ;;  %v2223_v51 = vpack.c.bf16 %v1404_v8, %v1403_v16 }
 0x215   :  { %2194 = vmatpush3.bf16.msra.mxu1 %v2193_v56  ;;  %v2225_v56 = vpack.c.bf16 %v1388_v53, %v1387_v52 }
 0x216   :  { %2196 = vmatprep.subr.bf16.mxu1 %v2195_v57  ;;  %v2227_v57 = vpack.c.bf16 %v1406_v55, %v1405_v54 }
 0x219   :  { %2198 = vmatpush3.bf16.msra.mxu1 %v2197_v62  ;;  %v2229_v62 = vpack.c.bf16 %v1390_v59, %v1389_v58 }
 0x21a   :  { %2200 = vmatprep.subr.bf16.mxu1 %v2199_v63  ;;  %v2231_v63 = vpack.c.bf16 %v1408_v61, %v1407_v60 }
 0x21d   :  { %2202 = vmatpush3.bf16.msra.mxu1 %v2201_v4  ;;  %v2233_v4 = vpack.c.bf16 %v1392_v1, %v1391_v0 }
 0x21e   :  { %2204 = vmatprep.subr.bf16.mxu1 %v2203_v5  ;;  %v2235_v5 = vpack.c.bf16 %v1410_v3, %v1409_v2 }
 0x221   :  { %2206 = vmatpush3.bf16.msra.mxu1 %v2205_v11  ;;  %v2237_v11 = vpack.c.bf16 %v1394_v7, %v1393_v6 }
 0x222   :  { %2208 = vmatprep.subr.bf16.mxu1 %v2207_v12  ;;  %v2239_v12 = vpack.c.bf16 %v1412_v10, %v1411_v9 }
 0x225   :  { %2210 = vmatpush3.bf16.msra.mxu1 %v2209_v15  ;;  %v1413_v15 = vld [vmem:[#allocation11 + $0x1f0] sm:$0xff] }
 0x226   :  { %2212 = vmatprep.subr.bf16.mxu1 %v2211_v20  ;;  %v912_v20 = vrot.slane %v2643_v26, %v272_v44  ;;  %v2243_v21 = vpack.c.bf16 %v1414_v18, %v1413_v15 }
 0x229   :  { %2214 = vmatpush3.bf16.msra.mxu1 %v2213_v38  ;;  %v1398_v38 = vld [vmem:[#allocation11 + $0x178] sm:$0xff] }
 0x22a   :  { %2216 = vmatprep.subr.bf16.mxu1 %v2215_v25  ;;  %v2245_v24 = vpack.c.bf16 %v1398_v38, %v1397_v22 }
 0x2df   :  { %v1129_v30 = vpop.f32.mrb[2].mxu1  ;;  %v2654_v31 = vpop.f32.mrb[4].mxu0 }
 0x2e0   :  { %v2247_v32 = vadd.f32 %v1129_v30, %v904_v27  ;;  %v1131_v33 = vpop.f32.mrb[3].mxu1  ;;  %v1344_v34 = vpop.f32.mrb[5].mxu0  ;;  %v2249_v43 = vadd.f32 %v2654_v31, %v912_v20  ;;  %v1584_v30 = vld [vmem:[#allocation13] ss:$0 sm:$0xff] }
 0x2e1   :  { %v2248_v23 = vadd.f32 %v1131_v33, %v908_v28  ;;  %v2250_v41 = vadd.f32 %v1344_v34, %v916_v29 }
 0x2e2   :  { %v1347_v47 = vmax.f32 %v2247_v32, 0.0  ;;  %v1349_v25 = vmax.f32 %v2249_v43, 0.0 }
 0x2e3   :  { %v1348_v45 = vmax.f32 %v2248_v23, 0.0  ;;  %v1350_v50 = vmax.f32 %v2250_v41, 0.0 }
 0x2e5   :  { %1486 = vmatprep.mubr.f32.mxu1 %v1348_v45 }
 0x2e6   :  { %1487 = vmatmul.mubr.f32.vlgmr.msra.gmra.mrb[4].mxu1 %v1347_v47 }
 0x2e7   :  { %2218 = vmatpush3.bf16.msra.mxu1 %v2217_v46  ;;  %1556 = vmatprep.mubr.f32.mxu1 %v1350_v50 }
 0x2e8   :  { %2220 = vmatprep.subr.bf16.mxu1 %v2219_v39 }
 0x2eb   :  { %2222 = vmatpush3.bf16.msra.mxu1 %v2221_v17 }
 0x2ec   :  { %2224 = vmatprep.subr.bf16.mxu1 %v2223_v51 }
 0x2ef   :  { %2226 = vmatpush3.bf16.msra.mxu1 %v2225_v56 }
 0x2f0   :  { %2228 = vmatprep.subr.bf16.mxu1 %v2227_v57 }
 0x2f3   :  { %2230 = vmatpush3.bf16.msra.mxu1 %v2229_v62 }
 0x2f4   :  { %2232 = vmatprep.subr.bf16.mxu1 %v2231_v63 }
 0x2f7   :  { %2234 = vmatpush3.bf16.msra.mxu1 %v2233_v4 }
 0x2f8   :  { %2236 = vmatprep.subr.bf16.mxu1 %v2235_v5 }
 0x2fb   :  { %2238 = vmatpush3.bf16.msra.mxu1 %v2237_v11 }
 0x2fc   :  { %2240 = vmatprep.subr.bf16.mxu1 %v2239_v12 }
 0x2ff   :  { %2242 = vmatpush3.bf16.msra.mxu1 %v2241_v19 }
 0x300   :  { %2244 = vmatprep.subr.bf16.mxu1 %v2243_v21 }
 0x303   :  { %2246 = vmatpush3.bf16.msra.mxu1 %v2245_v24 }
 0x306   :  { %1557 = vmatmul.mubr.f32.vlgmr.msra.gmra.mrb[6].mxu1 %v1349_v25 }
 0x3b9   :  { %v1617_v27 = vpop.f32.mrb[4].mxu1 }
 0x3ba   :  { %v1618_v28 = vpop.f32.mrb[5].mxu1 }
 0x3bb   :  { %v1619_v29 = vadd.f32 %v1618_v28, %v1617_v27 }
 0x3bd   :  { %v1489_v44 = vadd.f32 %v1619_v29, %v1584_v30 }
 0x3d9   :  { %v1652_v32 = vpop.f32.mrb[6].mxu1 }
 0x3da   :  { %v1653_v36 = vpop.f32.mrb[7].mxu1 }
 0x3db   :  { %v1654_v26 = vadd.f32 %v1653_v36, %v1652_v32 }
 0x3dd   :  { %v1559_v33 = vadd.f32 %v1654_v26, %v1489_v44 }
 0x3df   :  { %1562 = vst [vmem:[#allocation14] sm:$0xff] %v1559_v33 }
 0x3e0   :  { %2439 = shalt.err (!%p2436_p4)
}
 0x3e1   :  { %s2440_s15 = scalar_lea.hbm %s2679_s7, 128 }
 0x3e2   :  { %p2441_p5 = scmp.ne.s32.totalorder %s2679_s7, %s2440_s15  ;;  %p2444_p6 = scmp.lt.u32.totalorder %s2440_s15, %s2679_s7 }
 0x3e4   :  { %p2446_p7 = pnand %p2444_p6, %p2441_p5 }
 0x3e6   :  { %2449 = shalt.err (!%p2446_p7)
}
 0x3e7   :  { %1572 = dma.vmem_to_hbm [thread:$0]  %s1570_s13, 128, %s2679_s7, [#allocation4]  }
 0x3e8   :  { %2458 = dma.done.wait [#allocation4], 128  }
 0x3e9   :  { %2459 = vsyncadd [#allocation4], 4294967168 }
 0x3ea   :  { %1576 = vsyncpa [#allocation3], 1 }
 0x3eb   :  { %1577 = vsyncpa [#allocation6], 1 }
 0x3ec   :  { %1578 = vsyncpa [#allocation9], 1 }
 0x3ed   :  { %1579 = vsyncpa [#allocation12], 1 }
 0x3ee   :  { %1580 = vsyncpa [#allocation4], 1 }

</bundles_post_ra>
